<compile_context>
chip_gen: v7x
topology: tpu7x:2x2x1
jax: 0.10.0
libtpu: 0.0.40
codegen_flags: <defaults>
</compile_context>

<pallas_src>
import numpy as np
import jax
import jax.numpy as jnp
from jax.experimental import pallas as pl
from jax.experimental.pallas import tpu as pltpu

EPS = 1e-5


def _pick_group(W, C):
    """Width-group size G: output lanes G*C, per-ky contraction (G+2)*C.

    Prefer the smallest divisor of W giving >=128 output lanes (dense vregs,
    MXU-friendly) while keeping the (G+2)/3 MXU-FLOP overhead small; otherwise
    the largest divisor <= 8.  At SRGAN C=64, W=24 this picks G=2
    (128-lane output, 256-deep contraction, 1.33x FLOP overhead).
    """
    divisors = [g for g in range(1, W + 1) if W % g == 0]
    for g in divisors:
        if g * C >= 128 and g <= 8:
            return g
    return max(g for g in divisors if g <= 8)


def _vmem_limit_bytes(est):
    """Generation-aware scoped-VMEM request: actual resident set + margin,
    capped below physical capacity with compiler headroom."""
    try:
        cap = int(pltpu.get_tpu_info().vmem_capacity_bytes)
    except Exception:  # pragma: no cover - conservative fallback (v7x minimum)
        cap = 64 << 20
    return int(min(cap - (16 << 20), max(32 << 20, int(1.3 * est))))


def _make_kernel(N, H, W, C, G, P, matmul_dtype):
    Wg = W // G
    GC = G * C
    KC = (G + 2) * C
    M = N * H * Wg
    inv_cnt = 1.0 / float(N * H * W)        # per-channel BN element count

    def kernel(x_ref, m_ref, w1_ref, w2_ref, bn_ref, fold_ref, unfold_ref,
               alpha_ref, o_ref, pad_ref):
        xv = x_ref[...]                                    # (M, GC)
        x32 = xv.astype(jnp.float32)

        m = m_ref[...]                                     # (M, 4) 0/1 masks
        hm_up = m[:, 0:1]        # source row h-1 inside the image
        hm_dn = m[:, 1:2]        # source row h+1 inside the image
        wl = m[:, 2:3]           # left  W-halo inside the image row
        wr = m[:, 3:4]           # right W-halo inside the image row

        # Zero the top/bottom halo pads of the scratch once; both convs reuse
        # the interior.  All halo handling below is plain static ref slices.
        zpad = jnp.zeros((P, GC), matmul_dtype)
        pad_ref[0:P, :] = zpad
        pad_ref[P + M:P + M + P, :] = zpad

        def conv3x3(v, w_ref):
            """3x3 conv of the width-grouped (M, GC) activation `v`.

            One MXU matmul per kernel row ky; kx taps live in the compact
            ((G+2)*C, G*C) weight slab.  Conv bias omitted: it cancels exactly
            under training-mode BN.  Returns f32 (M, GC).
            """
            pad_ref[P:P + M, :] = v
            acc = None
            for k, dy in enumerate((-1, 0, 1)):
                base = P + dy * Wg
                mid = v if dy == 0 else pad_ref[base:base + M, :]
                left = pad_ref[base - 1:base - 1 + M, GC - C:GC] * wl
                right = pad_ref[base + 1:base + 1 + M, 0:C] * wr
                slab = jnp.concatenate([left, mid, right], axis=1)  # (M, KC)
                if dy == -1:
                    slab = slab * hm_up
                elif dy == 1:
                    slab = slab * hm_dn
                part = jnp.dot(slab, w_ref[k],
                               preferred_element_type=jnp.float32)
                acc = part if acc is None else acc + part
            return acc

        def batchnorm(y, gamma, beta):
            """Training-mode BN (batch stats, biased var) folded to one FMA."""
            s1 = jnp.sum(y, axis=0, keepdims=True)                  # (1, GC)
            s2 = jnp.sum(y * y, axis=0, keepdims=True)              # (1, GC)
            s = jnp.dot(jnp.concatenate([s1, s2], axis=0), fold_ref[...],
                        preferred_element_type=jnp.float32)         # (2, C)
            mean = s[0:1, :] * inv_cnt
            var = jnp.maximum(s[1:2, :] * inv_cnt - mean * mean, 0.0)
            scale = jax.lax.rsqrt(var + EPS) * gamma
            shift = beta - mean * scale
            ss = jnp.dot(jnp.concatenate([scale, shift], axis=0),
                         unfold_ref[...],
                         preferred_element_type=jnp.float32)        # (2, GC)
            return y * ss[0:1, :] + ss[1:2, :]

        alpha = alpha_ref[0, 0]

        # --- conv block 1: Conv3x3 -> BN -> PReLU ---
        y = conv3x3(xv.astype(matmul_dtype), w1_ref)       # single bf16 cast
        y = batchnorm(y, bn_ref[0:1, :], bn_ref[1:2, :])
        y = jnp.where(y > 0, y, alpha * y)

        # --- conv block 2: Conv3x3 -> BN ---
        y = conv3x3(y.astype(matmul_dtype), w2_ref)
        y = batchnorm(y, bn_ref[2:3, :], bn_ref[3:4, :])

        # --- residual add, lane-dense store ---
        o_ref[...] = (y + x32).astype(o_ref.dtype)

    return kernel


def prepare_params(params, x_shape, *, group=None, matmul_dtype=jnp.bfloat16):
    """One-time (per shape / dtype) construction of the kernel operands,
    hoisted out of the forward call."""
    N, C, H, W = x_shape
    G = _pick_group(W, C) if group is None else group
    assert W % G == 0, "group width must divide W"
    Wg, GC, KC = W // G, G * C, (G + 2) * C
    M = N * H * Wg

    def conv_weight(w):
        # torch (O, I, 3, 3) -> (3, (G+2)*C, G*C): kx taps + width grouping
        # folded into a compact block-banded slab (bias dropped: cancels in BN).
        wt = jnp.transpose(jnp.asarray(w, jnp.float32), (2, 3, 1, 0))  # ky,kx,ci,co
        mats = []
        for ky in range(3):
            mat = jnp.zeros((KC, GC), jnp.float32)
            for kx in range(3):
                sel = jnp.eye(G + 2, G, k=-kx, dtype=jnp.float32)   # p == g + kx
                mat = mat + jnp.kron(sel, wt[ky, kx])
            mats.append(mat)
        return jnp.stack(mats).astype(matmul_dtype)

    # per-row 0/1 edge masks for the H halo (image rows) and W halo (groups)
    r = np.arange(M)
    h = (r // Wg) % H
    wg = r % Wg
    masks = np.stack([h >= 1, h <= H - 2, wg >= 1, wg <= Wg - 2],
                     axis=1).astype(np.float32)

    fold = jnp.tile(jnp.eye(C, dtype=jnp.float32), (G, 1))            # (GC, C)

    return {
        "shape": (N, C, H, W),
        "G": G,
        "matmul_dtype": matmul_dtype,
        "w1": conv_weight(params["w1"]),
        "w2": conv_weight(params["w2"]),
        "bn": jnp.stack([params["g1"], params["be1"],
                         params["g2"], params["be2"]]).astype(jnp.float32),
        "fold": fold,                                                 # exact 0/1
        "unfold": fold.T,                                             # (C, GC)
        "alpha": jnp.reshape(params["alpha"], (1, 1)).astype(jnp.float32),
        "masks": jnp.asarray(masks, matmul_dtype),
    }


def residual_block(x_nchw, prep):
    N, C, H, W = prep["shape"]
    assert x_nchw.shape == (N, C, H, W)
    G = prep["G"]
    matmul_dtype = prep["matmul_dtype"]
    Wg, GC, KC = W // G, G * C, (G + 2) * C
    M = N * H * Wg
    P = ((Wg + 1 + 15) // 16) * 16           # halo pad rows (packing aligned)

    # NCHW -> NHWC -> width-grouped lane-dense (N*H*W/G, G*C).
    x2d = jnp.transpose(x_nchw, (0, 2, 3, 1)).reshape(M, GC)

    mm = jnp.dtype(matmul_dtype).itemsize
    est = (2 * M * GC * 4                    # kernel input + output (f32)
           + 3 * M * GC * 4                  # f32 activation temporaries
           + (M + 2 * P) * GC * mm           # zero-padded halo scratch
           + 2 * M * KC * mm                 # conv input slabs
           + 2 * 3 * KC * GC * mm            # both convs' weight slabs
           + (1 << 20))

    vmem = pl.BlockSpec(memory_space=pltpu.MemorySpace.VMEM)
    smem = pl.BlockSpec(memory_space=pltpu.MemorySpace.SMEM)

    out2d = pl.pallas_call(
        _make_kernel(N, H, W, C, G, P, matmul_dtype),
        out_shape=jax.ShapeDtypeStruct((M, GC), x_nchw.dtype),
        in_specs=[vmem, vmem, vmem, vmem, vmem, vmem, vmem, smem],
        out_specs=vmem,
        scratch_shapes=[pltpu.VMEM((M + 2 * P, GC), matmul_dtype)],
        compiler_params=pltpu.CompilerParams(
            vmem_limit_bytes=_vmem_limit_bytes(est)),
    )(x2d, prep["masks"], prep["w1"], prep["w2"], prep["bn"],
      prep["fold"], prep["unfold"], prep["alpha"])

    return jnp.transpose(out2d.reshape(N, H, W, C), (0, 3, 1, 2))


def reference_forward(x, params):
    """Plain-JAX f32 reference matching the PyTorch training-mode forward."""
    def conv(x, w, b):
        y = jax.lax.conv_general_dilated(
            x, w, window_strides=(1, 1), padding=((1, 1), (1, 1)),
            dimension_numbers=("NCHW", "OIHW", "NCHW"),
            precision=jax.lax.Precision.HIGHEST)
        return y + b[None, :, None, None]

    def bn(y, g, be):
        m = y.mean(axis=(0, 2, 3), keepdims=True)
        v = ((y - m) ** 2).mean(axis=(0, 2, 3), keepdims=True)
        return (y - m) * jax.lax.rsqrt(v + EPS) * g[None, :, None, None] \
            + be[None, :, None, None]

    y = conv(x, params["w1"], params["b1"])
    y = bn(y, params["g1"], params["be1"])
    y = jnp.where(y > 0, y, params["alpha"] * y)
    y = conv(y, params["w2"], params["b2"])
    y = bn(y, params["g2"], params["be2"])
    return y + x


if __name__ == "__main__":
    N, C, H, W = 2, 4, 16, 16            # small test shapes; SRGAN default is C=64
    key = jax.random.PRNGKey(0)
    kx_, kw1, kb1, kw2, kb2, kg1, kbe1, kg2, kbe2 = jax.random.split(key, 9)

    x = jax.random.normal(kx_, (N, C, H, W), dtype=jnp.float32)
    params = {
        "w1": 0.1 * jax.random.normal(kw1, (C, C, 3, 3), jnp.float32),
        "b1": 0.1 * jax.random.normal(kb1, (C,), jnp.float32),
        "g1": 1.0 + 0.1 * jax.random.normal(kg1, (C,), jnp.float32),
        "be1": 0.1 * jax.random.normal(kbe1, (C,), jnp.float32),
        "alpha": jnp.asarray(0.25, jnp.float32),      # PReLU default init
        "w2": 0.1 * jax.random.normal(kw2, (C, C, 3, 3), jnp.float32),
        "b2": 0.1 * jax.random.normal(kb2, (C,), jnp.float32),
        "g2": 1.0 + 0.1 * jax.random.normal(kg2, (C,), jnp.float32),
        "be2": 0.1 * jax.random.normal(kbe2, (C,), jnp.float32),
    }

    ref = reference_forward(x, params)

    # Performance path: bf16 MXU operands, f32 accumulation / f32 BN statistics.
    prep_bf16 = prepare_params(params, x.shape, matmul_dtype=jnp.bfloat16)
    out = jax.block_until_ready(residual_block(x, prep_bf16))
    assert out.shape == (N, C, H, W) and out.dtype == x.dtype
    err_bf16 = float(jnp.max(jnp.abs(out - ref)))
    # bf16 operand rounding through two conv layers on ~unit-scale activations.
    assert err_bf16 < 3e-2, f"bf16 path mismatch vs reference: {err_bf16}"

    # Verification path: identical kernel structure with f32 matmul operands.
    prep_f32 = prepare_params(params, x.shape, matmul_dtype=jnp.float32)
    out_f32 = jax.block_until_ready(residual_block(x, prep_f32))
    err_f32 = float(jnp.max(jnp.abs(out_f32 - ref)))
    assert err_f32 < 2e-3, f"f32 path mismatch vs reference: {err_f32}"

    print("KERNEL_OK")
</pallas_src>

<mosaic_0001>
module attributes {stable_mosaic.version = 11 : i64} {
  func.func @kernel(%arg0: memref<64x32xf32, #tpu.memory_space<vmem>>, %arg1: memref<64x4xbf16, #tpu.memory_space<vmem>>, %arg2: memref<3x40x32xbf16, #tpu.memory_space<vmem>>, %arg3: memref<3x40x32xbf16, #tpu.memory_space<vmem>>, %arg4: memref<4x4xf32, #tpu.memory_space<vmem>>, %arg5: memref<32x4xf32, #tpu.memory_space<vmem>>, %arg6: memref<4x32xf32, #tpu.memory_space<vmem>>, %arg7: memref<1x1xf32, #tpu.memory_space<smem>>, %arg8: memref<64x32xf32, #tpu.memory_space<vmem>>, %arg9: memref<96x32xbf16, #tpu.memory_space<vmem>>) attributes {dimension_semantics = [], scalar_prefetch = 0 : i64, scratch_operands = 1 : i64, tpu.core_type = #tpu.core_type<tc>} {
    %c0 = arith.constant 0 : index
    %c0_0 = arith.constant 0 : index
    %0 = vector.load %arg0[%c0, %c0_0] : memref<64x32xf32, #tpu.memory_space<vmem>>, vector<64x32xf32>
    %c0_1 = arith.constant 0 : index
    %c0_2 = arith.constant 0 : index
    %1 = vector.load %arg1[%c0_1, %c0_2] : memref<64x4xbf16, #tpu.memory_space<vmem>>, vector<64x4xbf16>
    %2 = vector.extract_strided_slice %1 {offsets = [0, 0], sizes = [64, 1], strides = [1, 1]} : vector<64x4xbf16> to vector<64x1xbf16>
    %3 = vector.extract_strided_slice %1 {offsets = [0, 1], sizes = [64, 1], strides = [1, 1]} : vector<64x4xbf16> to vector<64x1xbf16>
    %4 = vector.extract_strided_slice %1 {offsets = [0, 2], sizes = [64, 1], strides = [1, 1]} : vector<64x4xbf16> to vector<64x1xbf16>
    %5 = vector.extract_strided_slice %1 {offsets = [0, 3], sizes = [64, 1], strides = [1, 1]} : vector<64x4xbf16> to vector<64x1xbf16>
    %cst = arith.constant 0.000000e+00 : bf16
    %6 = vector.broadcast %cst : bf16 to vector<16x32xbf16>
    %c0_3 = arith.constant 0 : index
    %c0_4 = arith.constant 0 : index
    %7 = vector.load %arg9[%c0_3, %c0_4] : memref<96x32xbf16, #tpu.memory_space<vmem>>, vector<16x32xbf16>
    tpu.vector_store %arg9[%c0_3, %c0_4], %6 {strides = array<i32>} : memref<96x32xbf16, #tpu.memory_space<vmem>>, vector<16x32xbf16>,
    %c80 = arith.constant 80 : index
    %c0_5 = arith.constant 0 : index
    %8 = vector.load %arg9[%c80, %c0_5] : memref<96x32xbf16, #tpu.memory_space<vmem>>, vector<16x32xbf16>
    tpu.vector_store %arg9[%c80, %c0_5], %6 {strides = array<i32>} : memref<96x32xbf16, #tpu.memory_space<vmem>>, vector<16x32xbf16>,
    %c0_6 = arith.constant 0 : index
    %c0_7 = arith.constant 0 : index
    %9 = memref.load %arg7[%c0_6, %c0_7] : memref<1x1xf32, #tpu.memory_space<smem>>
    %10 = arith.truncf %0 : vector<64x32xf32> to vector<64x32xbf16>
    %c16 = arith.constant 16 : index
    %c0_8 = arith.constant 0 : index
    %11 = vector.load %arg9[%c16, %c0_8] : memref<96x32xbf16, #tpu.memory_space<vmem>>, vector<64x32xbf16>
    tpu.vector_store %arg9[%c16, %c0_8], %10 {strides = array<i32>} : memref<96x32xbf16, #tpu.memory_space<vmem>>, vector<64x32xbf16>,
    %c14 = arith.constant 14 : index
    %c0_9 = arith.constant 0 : index
    %12 = vector.load %arg9[%c14, %c0_9] : memref<96x32xbf16, #tpu.memory_space<vmem>>, vector<64x32xbf16>
    %c13 = arith.constant 13 : index
    %c28 = arith.constant 28 : index
    %13 = vector.load %arg9[%c13, %c28] : memref<96x32xbf16, #tpu.memory_space<vmem>>, vector<64x4xbf16>
    %14 = vector.broadcast %4 : vector<64x1xbf16> to vector<64x4xbf16>
    %15 = arith.mulf %13, %14 : vector<64x4xbf16>
    %c15 = arith.constant 15 : index
    %c0_10 = arith.constant 0 : index
    %16 = vector.load %arg9[%c15, %c0_10] : memref<96x32xbf16, #tpu.memory_space<vmem>>, vector<64x4xbf16>
    %17 = vector.broadcast %5 : vector<64x1xbf16> to vector<64x4xbf16>
    %18 = arith.mulf %16, %17 : vector<64x4xbf16>
    %19 = tpu.concatenate %15, %12, %18 in 1 : vector<64x4xbf16>, vector<64x32xbf16>, vector<64x4xbf16> -> vector<64x40xbf16>
    %20 = vector.broadcast %2 : vector<64x1xbf16> to vector<64x40xbf16>
    %21 = arith.mulf %19, %20 : vector<64x40xbf16>
    %c0_11 = arith.constant 0 : index
    %c0_12 = arith.constant 0 : index
    %c0_13 = arith.constant 0 : index
    %22 = vector.load %arg2[%c0_11, %c0_12, %c0_13] : memref<3x40x32xbf16, #tpu.memory_space<vmem>>, vector<1x40x32xbf16>
    %23 = vector.shape_cast %22 : vector<1x40x32xbf16> to vector<40x32xbf16>
    %cst_14 = arith.constant dense<0.000000e+00> : vector<64x32xf32>
    %24 = tpu.matmul %21, %23, %cst_14 {dimension_numbers = #tpu.dot_dimension_numbers<[1], [0], [0], [1], [0, 0, 1, 1], [], []>} : vector<64x40xbf16>, vector<40x32xbf16>, vector<64x32xf32> -> vector<64x32xf32>
    %c15_15 = arith.constant 15 : index
    %c28_16 = arith.constant 28 : index
    %25 = vector.load %arg9[%c15_15, %c28_16] : memref<96x32xbf16, #tpu.memory_space<vmem>>, vector<64x4xbf16>
    %26 = vector.broadcast %4 : vector<64x1xbf16> to vector<64x4xbf16>
    %27 = arith.mulf %25, %26 : vector<64x4xbf16>
    %c17 = arith.constant 17 : index
    %c0_17 = arith.constant 0 : index
    %28 = vector.load %arg9[%c17, %c0_17] : memref<96x32xbf16, #tpu.memory_space<vmem>>, vector<64x4xbf16>
    %29 = vector.broadcast %5 : vector<64x1xbf16> to vector<64x4xbf16>
    %30 = arith.mulf %28, %29 : vector<64x4xbf16>
    %31 = tpu.concatenate %27, %10, %30 in 1 : vector<64x4xbf16>, vector<64x32xbf16>, vector<64x4xbf16> -> vector<64x40xbf16>
    %c1 = arith.constant 1 : index
    %c0_18 = arith.constant 0 : index
    %c0_19 = arith.constant 0 : index
    %32 = vector.load %arg2[%c1, %c0_18, %c0_19] : memref<3x40x32xbf16, #tpu.memory_space<vmem>>, vector<1x40x32xbf16>
    %33 = vector.shape_cast %32 : vector<1x40x32xbf16> to vector<40x32xbf16>
    %cst_20 = arith.constant dense<0.000000e+00> : vector<64x32xf32>
    %34 = tpu.matmul %31, %33, %cst_20 {dimension_numbers = #tpu.dot_dimension_numbers<[1], [0], [0], [1], [0, 0, 1, 1], [], []>} : vector<64x40xbf16>, vector<40x32xbf16>, vector<64x32xf32> -> vector<64x32xf32>
    %35 = arith.addf %24, %34 : vector<64x32xf32>
    %c18 = arith.constant 18 : index
    %c0_21 = arith.constant 0 : index
    %36 = vector.load %arg9[%c18, %c0_21] : memref<96x32xbf16, #tpu.memory_space<vmem>>, vector<64x32xbf16>
    %c17_22 = arith.constant 17 : index
    %c28_23 = arith.constant 28 : index
    %37 = vector.load %arg9[%c17_22, %c28_23] : memref<96x32xbf16, #tpu.memory_space<vmem>>, vector<64x4xbf16>
    %38 = vector.broadcast %4 : vector<64x1xbf16> to vector<64x4xbf16>
    %39 = arith.mulf %37, %38 : vector<64x4xbf16>
    %c19 = arith.constant 19 : index
    %c0_24 = arith.constant 0 : index
    %40 = vector.load %arg9[%c19, %c0_24] : memref<96x32xbf16, #tpu.memory_space<vmem>>, vector<64x4xbf16>
    %41 = vector.broadcast %5 : vector<64x1xbf16> to vector<64x4xbf16>
    %42 = arith.mulf %40, %41 : vector<64x4xbf16>
    %43 = tpu.concatenate %39, %36, %42 in 1 : vector<64x4xbf16>, vector<64x32xbf16>, vector<64x4xbf16> -> vector<64x40xbf16>
    %44 = vector.broadcast %3 : vector<64x1xbf16> to vector<64x40xbf16>
    %45 = arith.mulf %43, %44 : vector<64x40xbf16>
    %c2 = arith.constant 2 : index
    %c0_25 = arith.constant 0 : index
    %c0_26 = arith.constant 0 : index
    %46 = vector.load %arg2[%c2, %c0_25, %c0_26] : memref<3x40x32xbf16, #tpu.memory_space<vmem>>, vector<1x40x32xbf16>
    %47 = vector.shape_cast %46 : vector<1x40x32xbf16> to vector<40x32xbf16>
    %cst_27 = arith.constant dense<0.000000e+00> : vector<64x32xf32>
    %48 = tpu.matmul %45, %47, %cst_27 {dimension_numbers = #tpu.dot_dimension_numbers<[1], [0], [0], [1], [0, 0, 1, 1], [], []>} : vector<64x40xbf16>, vector<40x32xbf16>, vector<64x32xf32> -> vector<64x32xf32>
    %49 = arith.addf %35, %48 : vector<64x32xf32>
    %c0_28 = arith.constant 0 : index
    %c0_29 = arith.constant 0 : index
    %50 = vector.load %arg4[%c0_28, %c0_29] : memref<4x4xf32, #tpu.memory_space<vmem>>, vector<1x4xf32>
    %c1_30 = arith.constant 1 : index
    %c0_31 = arith.constant 0 : index
    %51 = vector.load %arg4[%c1_30, %c0_31] : memref<4x4xf32, #tpu.memory_space<vmem>>, vector<1x4xf32>
    %cst_32 = arith.constant dense<0.000000e+00> : vector<32xf32>
    %52 = vector.multi_reduction <add>, %49, %cst_32 [0] : vector<64x32xf32> to vector<32xf32>
    %53 = vector.shape_cast %52 : vector<32xf32> to vector<1x32xf32>
    %54 = arith.mulf %49, %49 : vector<64x32xf32>
    %cst_33 = arith.constant dense<0.000000e+00> : vector<32xf32>
    %55 = vector.multi_reduction <add>, %54, %cst_33 [0] : vector<64x32xf32> to vector<32xf32>
    %56 = vector.shape_cast %55 : vector<32xf32> to vector<1x32xf32>
    %57 = tpu.concatenate %53, %56 in 0 : vector<1x32xf32>, vector<1x32xf32> -> vector<2x32xf32>
    %c0_34 = arith.constant 0 : index
    %c0_35 = arith.constant 0 : index
    %58 = vector.load %arg5[%c0_34, %c0_35] : memref<32x4xf32, #tpu.memory_space<vmem>>, vector<32x4xf32>
    %cst_36 = arith.constant dense<0.000000e+00> : vector<2x4xf32>
    %59 = tpu.matmul %57, %58, %cst_36 {dimension_numbers = #tpu.dot_dimension_numbers<[1], [0], [0], [1], [0, 0, 1, 1], [], []>} : vector<2x32xf32>, vector<32x4xf32>, vector<2x4xf32> -> vector<2x4xf32>
    %60 = vector.extract_strided_slice %59 {offsets = [0, 0], sizes = [1, 4], strides = [1, 1]} : vector<2x4xf32> to vector<1x4xf32>
    %cst_37 = arith.constant 0.001953125 : f32
    %61 = vector.broadcast %cst_37 : f32 to vector<1x4xf32>
    %62 = arith.mulf %60, %61 : vector<1x4xf32>
    %63 = vector.extract_strided_slice %59 {offsets = [1, 0], sizes = [1, 4], strides = [1, 1]} : vector<2x4xf32> to vector<1x4xf32>
    %cst_38 = arith.constant 0.001953125 : f32
    %64 = vector.broadcast %cst_38 : f32 to vector<1x4xf32>
    %65 = arith.mulf %63, %64 : vector<1x4xf32>
    %66 = arith.mulf %62, %62 : vector<1x4xf32>
    %67 = arith.subf %65, %66 : vector<1x4xf32>
    %cst_39 = arith.constant 0.000000e+00 : f32
    %68 = vector.broadcast %cst_39 : f32 to vector<1x4xf32>
    %69 = arith.maximumf %67, %68 : vector<1x4xf32>
    %cst_40 = arith.constant 9.99999974E-6 : f32
    %70 = vector.broadcast %cst_40 : f32 to vector<1x4xf32>
    %71 = arith.addf %69, %70 : vector<1x4xf32>
    %72 = math.rsqrt %71 : vector<1x4xf32>
    %73 = arith.mulf %72, %50 : vector<1x4xf32>
    %74 = arith.mulf %62, %73 : vector<1x4xf32>
    %75 = arith.subf %51, %74 : vector<1x4xf32>
    %76 = tpu.concatenate %73, %75 in 0 : vector<1x4xf32>, vector<1x4xf32> -> vector<2x4xf32>
    %c0_41 = arith.constant 0 : index
    %c0_42 = arith.constant 0 : index
    %77 = vector.load %arg6[%c0_41, %c0_42] : memref<4x32xf32, #tpu.memory_space<vmem>>, vector<4x32xf32>
    %cst_43 = arith.constant dense<0.000000e+00> : vector<2x32xf32>
    %78 = tpu.matmul %76, %77, %cst_43 {dimension_numbers = #tpu.dot_dimension_numbers<[1], [0], [0], [1], [0, 0, 1, 1], [], []>} : vector<2x4xf32>, vector<4x32xf32>, vector<2x32xf32> -> vector<2x32xf32>
    %79 = vector.extract_strided_slice %78 {offsets = [0, 0], sizes = [1, 32], strides = [1, 1]} : vector<2x32xf32> to vector<1x32xf32>
    %80 = vector.broadcast %79 : vector<1x32xf32> to vector<64x32xf32>
    %81 = arith.mulf %49, %80 : vector<64x32xf32>
    %82 = vector.extract_strided_slice %78 {offsets = [1, 0], sizes = [1, 32], strides = [1, 1]} : vector<2x32xf32> to vector<1x32xf32>
    %83 = vector.broadcast %82 : vector<1x32xf32> to vector<64x32xf32>
    %84 = arith.addf %81, %83 : vector<64x32xf32>
    %cst_44 = arith.constant 0.000000e+00 : f32
    %85 = vector.broadcast %cst_44 : f32 to vector<64x32xf32>
    %86 = arith.cmpf ogt, %84, %85 : vector<64x32xf32>
    %87 = vector.broadcast %9 : f32 to vector<64x32xf32>
    %88 = arith.mulf %87, %84 : vector<64x32xf32>
    %89 = arith.select %86, %84, %88 : vector<64x32xi1>, vector<64x32xf32>
    %90 = arith.truncf %89 : vector<64x32xf32> to vector<64x32xbf16>
    %c16_45 = arith.constant 16 : index
    %c0_46 = arith.constant 0 : index
    %91 = vector.load %arg9[%c16_45, %c0_46] : memref<96x32xbf16, #tpu.memory_space<vmem>>, vector<64x32xbf16>
    tpu.vector_store %arg9[%c16_45, %c0_46], %90 {strides = array<i32>} : memref<96x32xbf16, #tpu.memory_space<vmem>>, vector<64x32xbf16>,
    %c14_47 = arith.constant 14 : index
    %c0_48 = arith.constant 0 : index
    %92 = vector.load %arg9[%c14_47, %c0_48] : memref<96x32xbf16, #tpu.memory_space<vmem>>, vector<64x32xbf16>
    %c13_49 = arith.constant 13 : index
    %c28_50 = arith.constant 28 : index
    %93 = vector.load %arg9[%c13_49, %c28_50] : memref<96x32xbf16, #tpu.memory_space<vmem>>, vector<64x4xbf16>
    %94 = vector.broadcast %4 : vector<64x1xbf16> to vector<64x4xbf16>
    %95 = arith.mulf %93, %94 : vector<64x4xbf16>
    %c15_51 = arith.constant 15 : index
    %c0_52 = arith.constant 0 : index
    %96 = vector.load %arg9[%c15_51, %c0_52] : memref<96x32xbf16, #tpu.memory_space<vmem>>, vector<64x4xbf16>
    %97 = vector.broadcast %5 : vector<64x1xbf16> to vector<64x4xbf16>
    %98 = arith.mulf %96, %97 : vector<64x4xbf16>
    %99 = tpu.concatenate %95, %92, %98 in 1 : vector<64x4xbf16>, vector<64x32xbf16>, vector<64x4xbf16> -> vector<64x40xbf16>
    %100 = vector.broadcast %2 : vector<64x1xbf16> to vector<64x40xbf16>
    %101 = arith.mulf %99, %100 : vector<64x40xbf16>
    %c0_53 = arith.constant 0 : index
    %c0_54 = arith.constant 0 : index
    %c0_55 = arith.constant 0 : index
    %102 = vector.load %arg3[%c0_53, %c0_54, %c0_55] : memref<3x40x32xbf16, #tpu.memory_space<vmem>>, vector<1x40x32xbf16>
    %103 = vector.shape_cast %102 : vector<1x40x32xbf16> to vector<40x32xbf16>
    %cst_56 = arith.constant dense<0.000000e+00> : vector<64x32xf32>
    %104 = tpu.matmul %101, %103, %cst_56 {dimension_numbers = #tpu.dot_dimension_numbers<[1], [0], [0], [1], [0, 0, 1, 1], [], []>} : vector<64x40xbf16>, vector<40x32xbf16>, vector<64x32xf32> -> vector<64x32xf32>
    %c15_57 = arith.constant 15 : index
    %c28_58 = arith.constant 28 : index
    %105 = vector.load %arg9[%c15_57, %c28_58] : memref<96x32xbf16, #tpu.memory_space<vmem>>, vector<64x4xbf16>
    %106 = vector.broadcast %4 : vector<64x1xbf16> to vector<64x4xbf16>
    %107 = arith.mulf %105, %106 : vector<64x4xbf16>
    %c17_59 = arith.constant 17 : index
    %c0_60 = arith.constant 0 : index
    %108 = vector.load %arg9[%c17_59, %c0_60] : memref<96x32xbf16, #tpu.memory_space<vmem>>, vector<64x4xbf16>
    %109 = vector.broadcast %5 : vector<64x1xbf16> to vector<64x4xbf16>
    %110 = arith.mulf %108, %109 : vector<64x4xbf16>
    %111 = tpu.concatenate %107, %90, %110 in 1 : vector<64x4xbf16>, vector<64x32xbf16>, vector<64x4xbf16> -> vector<64x40xbf16>
    %c1_61 = arith.constant 1 : index
    %c0_62 = arith.constant 0 : index
    %c0_63 = arith.constant 0 : index
    %112 = vector.load %arg3[%c1_61, %c0_62, %c0_63] : memref<3x40x32xbf16, #tpu.memory_space<vmem>>, vector<1x40x32xbf16>
    %113 = vector.shape_cast %112 : vector<1x40x32xbf16> to vector<40x32xbf16>
    %cst_64 = arith.constant dense<0.000000e+00> : vector<64x32xf32>
    %114 = tpu.matmul %111, %113, %cst_64 {dimension_numbers = #tpu.dot_dimension_numbers<[1], [0], [0], [1], [0, 0, 1, 1], [], []>} : vector<64x40xbf16>, vector<40x32xbf16>, vector<64x32xf32> -> vector<64x32xf32>
    %115 = arith.addf %104, %114 : vector<64x32xf32>
    %c18_65 = arith.constant 18 : index
    %c0_66 = arith.constant 0 : index
    %116 = vector.load %arg9[%c18_65, %c0_66] : memref<96x32xbf16, #tpu.memory_space<vmem>>, vector<64x32xbf16>
    %c17_67 = arith.constant 17 : index
    %c28_68 = arith.constant 28 : index
    %117 = vector.load %arg9[%c17_67, %c28_68] : memref<96x32xbf16, #tpu.memory_space<vmem>>, vector<64x4xbf16>
    %118 = vector.broadcast %4 : vector<64x1xbf16> to vector<64x4xbf16>
    %119 = arith.mulf %117, %118 : vector<64x4xbf16>
    %c19_69 = arith.constant 19 : index
    %c0_70 = arith.constant 0 : index
    %120 = vector.load %arg9[%c19_69, %c0_70] : memref<96x32xbf16, #tpu.memory_space<vmem>>, vector<64x4xbf16>
    %121 = vector.broadcast %5 : vector<64x1xbf16> to vector<64x4xbf16>
    %122 = arith.mulf %120, %121 : vector<64x4xbf16>
    %123 = tpu.concatenate %119, %116, %122 in 1 : vector<64x4xbf16>, vector<64x32xbf16>, vector<64x4xbf16> -> vector<64x40xbf16>
    %124 = vector.broadcast %3 : vector<64x1xbf16> to vector<64x40xbf16>
    %125 = arith.mulf %123, %124 : vector<64x40xbf16>
    %c2_71 = arith.constant 2 : index
    %c0_72 = arith.constant 0 : index
    %c0_73 = arith.constant 0 : index
    %126 = vector.load %arg3[%c2_71, %c0_72, %c0_73] : memref<3x40x32xbf16, #tpu.memory_space<vmem>>, vector<1x40x32xbf16>
    %127 = vector.shape_cast %126 : vector<1x40x32xbf16> to vector<40x32xbf16>
    %cst_74 = arith.constant dense<0.000000e+00> : vector<64x32xf32>
    %128 = tpu.matmul %125, %127, %cst_74 {dimension_numbers = #tpu.dot_dimension_numbers<[1], [0], [0], [1], [0, 0, 1, 1], [], []>} : vector<64x40xbf16>, vector<40x32xbf16>, vector<64x32xf32> -> vector<64x32xf32>
    %129 = arith.addf %115, %128 : vector<64x32xf32>
    %c2_75 = arith.constant 2 : index
    %c0_76 = arith.constant 0 : index
    %130 = vector.load %arg4[%c2_75, %c0_76] : memref<4x4xf32, #tpu.memory_space<vmem>>, vector<1x4xf32>
    %c3 = arith.constant 3 : index
    %c0_77 = arith.constant 0 : index
    %131 = vector.load %arg4[%c3, %c0_77] : memref<4x4xf32, #tpu.memory_space<vmem>>, vector<1x4xf32>
    %cst_78 = arith.constant dense<0.000000e+00> : vector<32xf32>
    %132 = vector.multi_reduction <add>, %129, %cst_78 [0] : vector<64x32xf32> to vector<32xf32>
    %133 = vector.shape_cast %132 : vector<32xf32> to vector<1x32xf32>
    %134 = arith.mulf %129, %129 : vector<64x32xf32>
    %cst_79 = arith.constant dense<0.000000e+00> : vector<32xf32>
    %135 = vector.multi_reduction <add>, %134, %cst_79 [0] : vector<64x32xf32> to vector<32xf32>
    %136 = vector.shape_cast %135 : vector<32xf32> to vector<1x32xf32>
    %137 = tpu.concatenate %133, %136 in 0 : vector<1x32xf32>, vector<1x32xf32> -> vector<2x32xf32>
    %c0_80 = arith.constant 0 : index
    %c0_81 = arith.constant 0 : index
    %138 = vector.load %arg5[%c0_80, %c0_81] : memref<32x4xf32, #tpu.memory_space<vmem>>, vector<32x4xf32>
    %cst_82 = arith.constant dense<0.000000e+00> : vector<2x4xf32>
    %139 = tpu.matmul %137, %138, %cst_82 {dimension_numbers = #tpu.dot_dimension_numbers<[1], [0], [0], [1], [0, 0, 1, 1], [], []>} : vector<2x32xf32>, vector<32x4xf32>, vector<2x4xf32> -> vector<2x4xf32>
    %140 = vector.extract_strided_slice %139 {offsets = [0, 0], sizes = [1, 4], strides = [1, 1]} : vector<2x4xf32> to vector<1x4xf32>
    %cst_83 = arith.constant 0.001953125 : f32
    %141 = vector.broadcast %cst_83 : f32 to vector<1x4xf32>
    %142 = arith.mulf %140, %141 : vector<1x4xf32>
    %143 = vector.extract_strided_slice %139 {offsets = [1, 0], sizes = [1, 4], strides = [1, 1]} : vector<2x4xf32> to vector<1x4xf32>
    %cst_84 = arith.constant 0.001953125 : f32
    %144 = vector.broadcast %cst_84 : f32 to vector<1x4xf32>
    %145 = arith.mulf %143, %144 : vector<1x4xf32>
    %146 = arith.mulf %142, %142 : vector<1x4xf32>
    %147 = arith.subf %145, %146 : vector<1x4xf32>
    %cst_85 = arith.constant 0.000000e+00 : f32
    %148 = vector.broadcast %cst_85 : f32 to vector<1x4xf32>
    %149 = arith.maximumf %147, %148 : vector<1x4xf32>
    %cst_86 = arith.constant 9.99999974E-6 : f32
    %150 = vector.broadcast %cst_86 : f32 to vector<1x4xf32>
    %151 = arith.addf %149, %150 : vector<1x4xf32>
    %152 = math.rsqrt %151 : vector<1x4xf32>
    %153 = arith.mulf %152, %130 : vector<1x4xf32>
    %154 = arith.mulf %142, %153 : vector<1x4xf32>
    %155 = arith.subf %131, %154 : vector<1x4xf32>
    %156 = tpu.concatenate %153, %155 in 0 : vector<1x4xf32>, vector<1x4xf32> -> vector<2x4xf32>
    %c0_87 = arith.constant 0 : index
    %c0_88 = arith.constant 0 : index
    %157 = vector.load %arg6[%c0_87, %c0_88] : memref<4x32xf32, #tpu.memory_space<vmem>>, vector<4x32xf32>
    %cst_89 = arith.constant dense<0.000000e+00> : vector<2x32xf32>
    %158 = tpu.matmul %156, %157, %cst_89 {dimension_numbers = #tpu.dot_dimension_numbers<[1], [0], [0], [1], [0, 0, 1, 1], [], []>} : vector<2x4xf32>, vector<4x32xf32>, vector<2x32xf32> -> vector<2x32xf32>
    %159 = vector.extract_strided_slice %158 {offsets = [0, 0], sizes = [1, 32], strides = [1, 1]} : vector<2x32xf32> to vector<1x32xf32>
    %160 = vector.broadcast %159 : vector<1x32xf32> to vector<64x32xf32>
    %161 = arith.mulf %129, %160 : vector<64x32xf32>
    %162 = vector.extract_strided_slice %158 {offsets = [1, 0], sizes = [1, 32], strides = [1, 1]} : vector<2x32xf32> to vector<1x32xf32>
    %163 = vector.broadcast %162 : vector<1x32xf32> to vector<64x32xf32>
    %164 = arith.addf %161, %163 : vector<64x32xf32>
    %165 = arith.addf %164, %0 : vector<64x32xf32>
    %c0_90 = arith.constant 0 : index
    %c0_91 = arith.constant 0 : index
    %166 = vector.load %arg8[%c0_90, %c0_91] : memref<64x32xf32, #tpu.memory_space<vmem>>, vector<64x32xf32>
    tpu.vector_store %arg8[%c0_90, %c0_91], %165 {strides = array<i32>} : memref<64x32xf32, #tpu.memory_space<vmem>>, vector<64x32xf32>,
    return
  }
}

</mosaic_0001>

<bundles_post_ra>
// kernel: tpu_custom_call.1
= control target key start
LH: loop header
LB: loop body
LE: loop exit
PB: predicated region body
PF: predicated region fallthrough
CT: control target
= control target key end

     0   :  { %vm47_vm0 = vcmask 261120   ;;  %v3253_v0 = vmov 3   ;;  %v3254_v1 = vmov 2   ;;  %v3255_v3 = vmov 0   ;;  %s3259_s15 = smov 100   ;;  %s3260_s16 = smov 36   ;;  %s4609_s1 = inlined_call_operand.vmem [shape: bf16[64,4], index: 1, kind: input, shape index: {}]   ;;  %s4610_s0 = inlined_call_operand.vmem [shape: f32[64,32], index: 0, kind: input, shape index: {}]   ;;  %s4611_s2 = inlined_call_operand.vmem [shape: bf16[3,40,32], index: 2, kind: input, shape index: {}]   ;;  %s4612_s5 = inlined_call_operand.vmem [shape: f32[32,4], index: 5, kind: input, shape index: {}]   ;;  %s4613_s6 = inlined_call_operand.vmem [shape: f32[4,32], index: 6, kind: input, shape index: {}]   ;;  %s4614_s4 = inlined_call_operand.vmem [shape: f32[4,4], index: 4, kind: input, shape index: {}]   ;;  %s4615_s7 = inlined_call_operand.<no memory space> [shape: f32[1,1], index: 7, kind: input, shape index: {}]   ;;  %s4616_s3 = inlined_call_operand.vmem [shape: bf16[3,40,32], index: 3, kind: input, shape index: {}]   ;;  %s4617_s8 = inlined_call_operand.vmem [shape: f32[64,32], index: 8, kind: output, shape index: {}]  }
   0x1   :  { %3213 = vset.pattern.permute.xlu1 %v3253_v0  ;;  %3214 = vset.pattern.permute.xlu0 %v3254_v1  ;;  %v3312_v2 = vld [vmem:[%s4609_s1] sm:$0xf]  ;;  %48 = vst.msk [vmem:[#allocation2] sm:$0xff] %vm47_vm0, %v3255_v3  ;;  %49 = vst.msk [vmem:[#allocation2 + $0x28] sm:$0xff] %vm47_vm0, %v3255_v3  ;;  %v3321_v4 = vld [vmem:[%s4609_s1 + $0xc] sm:$0xf] }
   0x2   :  { %67 = vperm.xlu0 %3214, %v3312_v2   ;;  %229 = vperm.xlu1 %3213, %v3312_v2   ;;  %v3326_v5 = vld [vmem:[%s4609_s1 + $0x4] sm:$0xf]  ;;  %v32_v7 = vld [vmem:[%s4610_s0 + $0x8] sm:$0xff]  ;;  %v33_v8 = vld [vmem:[%s4610_s0 + $0x10] sm:$0xff]  ;;  %vm336_vm1 = vsmask.f32 7424 }
   0x3   :  { %v31_v6 = vld [vmem:[%s4610_s0] sm:$0xff]  ;;  %v34_v9 = vld [vmem:[%s4610_s0 + $0x18] sm:$0xff]  ;;  %v36_v13 = vld [vmem:[%s4610_s0 + $0x28] sm:$0xff]  ;;  %v3257_v49 = vmov 1   ;;  %vm181_vm2 = vsmask.f32 6400 }
   0x4   :  { %v51_v10 = vpack.c.bf16 %v32_v7, %v31_v6  ;;  %v52_v11 = vpack.c.bf16 %v34_v9, %v33_v8  ;;  %v35_v12 = vld [vmem:[%s4610_s0 + $0x20] sm:$0xff]  ;;  %v37_v14 = vld [vmem:[%s4610_s0 + $0x30] sm:$0xff]  ;;  %v38_v15 = vld [vmem:[%s4610_s0 + $0x38] sm:$0xff]  ;;  %vm683_vm3 = vsmask.f32 256  ;;  %vm447_vm4 = vcmask 1046528  }
   0x5   :  { %v3354_v16 = vpack.c.bf16 %v36_v13, %v35_v12  ;;  %v3359_v17 = vld [vmem:[%s4609_s1 + $0x14] sm:$0xf]  ;;  %v3363_v18 = vpack.c.bf16 %v38_v15, %v37_v14  ;;  %v3374_v19 = vld [vmem:[%s4609_s1 + $0x8] sm:$0xf]  ;;  %v3383_v20 = vld [vmem:[%s4609_s1 + $0x10] sm:$0xf]  ;;  %v73_v12 = vlaneseq }
   0x6   :  { %103 = vperm.xlu0 %3214, %v3321_v4   ;;  %240 = vperm.xlu1 %3213, %v3326_v5   ;;  %55 = vst.msk [vmem:[#allocation2 + $0x8] sm:$0xff] %vm47_vm0, %v51_v10  ;;  %56 = vst.msk [vmem:[#allocation2 + $0x10] sm:$0xff] %vm47_vm0, %v52_v11  ;;  %v3390_v21 = vld [vmem:[%s4609_s1 + $0x1c] sm:$0xf]  ;;  %v3395_v22 = vld [vmem:[%s4609_s1 + $0x18] sm:$0xf] }
   0x7   :  { %57 = vst.msk [vmem:[#allocation2 + $0x18] sm:$0xff] %vm47_vm0, %v3354_v16  ;;  %58 = vst.msk [vmem:[#allocation2 + $0x20] sm:$0xff] %vm47_vm0, %v3363_v18  ;;  %v721_v23 = vshll.u32 %v51_v10, 16  ;;  %v724_v24 = vshrl.u32 %v51_v10, 16  ;;  %v728_v25 = vshll.u32 %v52_v11, 16  ;;  %v732_v29 = vshrl.u32 %v52_v11, 16 }
   0x8   :  { %v3403_v30 = vld [vmem:[#allocation2] sm:$0x80]  ;;  %v736_v31 = vshll.u32 %v3354_v16, 16  ;;  %s3256_s1 = smov 4   ;;  %v740_v42 = vshrl.u32 %v3354_v16, 16  ;;  %v744_v43 = vshll.u32 %v3363_v18, 16 }
   0x9   :  { %v723_v26 = vrot.slane %v721_v23, 1  ;;  %v730_v28 = vrot.slane %v728_v25, 1  ;;  %v396_v34 = vshll.u32 %v3403_v30, 16  ;;  %v394_v38 = vshrl.u32 %v3403_v30, 16 }
   0xa   :  { %127 = vperm.xlu0 %3214, %v3359_v17   ;;  %284 = vperm.xlu1 %3213, %v3359_v17   ;;  %v738_v35 = vrot.slane %v736_v31, 1  ;;  %v746_v47 = vrot.slane %v744_v43, 1  ;;  %v748_v50 = vshrl.u32 %v3363_v18, 16  ;;  %v3258_v10 = vmov 839922192  }
   0xb   :  { %v726_v27 = vor.u32 %v724_v24, %v723_v26  ;;  %v734_v33 = vor.u32 %v732_v29, %v730_v28  ;;  %v398_v39 = vrot.slane %v396_v34, 1  ;;  %v71_v11 = vunpack.c.l.s4 %v3258_v10 }
   0xc   :  { %v742_v46 = vor.u32 %v740_v42, %v738_v35  ;;  %v750_v55 = vor.u32 %v748_v50, %v746_v47  ;;  %v3468_v16 = vshrl.u32 %v73_v12, 7  ;;  %vm4641_vm5 = vsmask.f32 1280 }
   0xd   :  { %v731_v32 = vsel %vm336_vm1, %v726_v27, %v730_v28  ;;  %v3411_v36 = vld [vmem:[#allocation2 + $0x8] sm:$0xff]  ;;  %v739_v37 = vsel %vm336_vm1, %v734_v33, %v738_v35  ;;  %v399_v41 = vor.u32 %v398_v39, %v394_v38  ;;  %v3424_v48 = vld [vmem:[#allocation2 + $0x10] sm:$0xff]  ;;  %v72_v15 = vunpack.c.0.s8 %v71_v11 }
   0xe   :  { %3216 = vset.pattern.permute.xlu0 %v3253_v0  ;;  %3215 = vset.pattern.permute.xlu1 %v3254_v1  ;;  %v401_v40 = vshll.u32 %v3411_v36, 16  ;;  %v747_v51 = vsel %vm336_vm1, %v742_v46, %v746_v47  ;;  %v405_v52 = vshrl.u32 %v3411_v36, 16  ;;  %v409_v53 = vshll.u32 %v3424_v48, 16  ;;  %v3432_v54 = vld [vmem:[#allocation2 + $0x18] sm:$0xff] }
   0xf   :  { %251 = vperm.xlu0 %3216, %v3374_v19   ;;  %79 = vperm.xlu1 %3215, %v3326_v5   ;;  %v413_v58 = vshrl.u32 %v3424_v48, 16  ;;  %v417_v59 = vshll.u32 %v3432_v54, 16  ;;  %vm875_vm6 = vcmask 1043456   ;;  %vm467_vm7 = vcmask 31744  }
  0x10   :  { %v403_v44 = vrot.slane %v401_v40, 1  ;;  %v3436_v57 = vrot.slane %v409_v53, 1  ;;  %vm483_vm8 = vcmask 293888   ;;  %vm862_vm9 = vcmask 326656  }
  0x11   :  { %v419_v62 = vrot.slane %v417_v59, 1  ;;  %vm4639_vm10 = vmmov 0   ;;  %vm4640_vm11 = vcmask 1040384  }
  0x12   :  { %v404_v45 = vsel %vm336_vm1, %v399_v41, %v403_v44  ;;  %v407_v56 = vor.u32 %v405_v52, %v403_v44  ;;  %v415_v61 = vor.u32 %v413_v58, %v3436_v57 }
  0x13   :  { %262 = vperm.xlu0 %3216, %v3321_v4   ;;  %91 = vperm.xlu1 %3215, %v3374_v19  }
  0x14   :  { %v412_v60 = vsel %vm336_vm1, %v407_v56, %v3436_v57  ;;  %v3448_v63 = vsel %vm336_vm1, %v415_v61, %v419_v62 }
  0x17   :  { %273 = vperm.xlu0 %3216, %v3383_v20   ;;  %115 = vperm.xlu1 %3215, %v3383_v20  }
  0x1b   :  { %3217 = vset.pattern.permute.xlu1 %v3253_v0  ;;  %306 = vperm.xlu0 %3216, %v3390_v21   ;;  %v3453_v0 = vld [vmem:[#allocation2 + $0x20] sm:$0x7f] }
  0x1c   :  { %295 = vperm.xlu1 %3217, %v3395_v22   ;;  %v429_v6 = vshrl.u32 %v3453_v0, 16 }
  0x1f   :  { %3219 = vset.pattern.permute.xlu0 %v3255_v3 }
  0x20   :  { %3218 = vset.pattern.permute.xlu1 %v3254_v1  ;;  %500 = vperm.xlu0 %3219, %v3312_v2   ;;  %v421_v1 = vshrl.u32 %v3432_v54, 16 }
  0x21   :  { %139 = vperm.xlu1 %3218, %v3395_v22  }
  0x24   :  { %533 = vperm.xlu0 %3219, %v3321_v4  }
  0x25   :  { %151 = vperm.xlu1 %3218, %v3390_v21  }
  0x28   :  { %555 = vperm.xlu0 %3219, %v3359_v17  }
  0x29   :  { %3220 = vset.pattern.permute.xlu1 %v3255_v3  ;;  %v3459_v3 = vor.u32 %v421_v1, %v419_v62 }
  0x2a   :  { %511 = vperm.xlu1 %3220, %v3326_v5  }
  0x2c   :  { %753 = vrot.lane.b32.xlu0 %v731_v32, %s3256_s1 }
  0x2e   :  { %522 = vperm.xlu1 %3220, %v3374_v19  }
  0x30   :  { %755 = vrot.lane.b32.xlu0 %v739_v37, %s3256_s1 }
  0x32   :  { %544 = vperm.xlu1 %3220, %v3383_v20  }
  0x34   :  { %566 = vperm.xlu0 %3219, %v3395_v22  }
  0x36   :  { %751 = vrot.lane.b32.xlu1 %v723_v26, %s3256_s1 }
  0x38   :  { %432 = vrot.lane.b32.xlu0 %v404_v45, %s3256_s1 }
  0x39   :  { %3221 = vset.pattern.permute.xlu0 %v3257_v49 }
  0x3a   :  { %577 = vperm.xlu1 %3220, %v3390_v21  }
  0x3c   :  { %1250 = vperm.xlu0 %3221, %v3312_v2   ;;  %v425_v2 = vshll.u32 %v3453_v0, 16 }
  0x3e   :  { %757 = vrot.lane.b32.xlu1 %v747_v51, %s3256_s1 }
  0x3f   :  { %3222 = vset.pattern.permute.xlu1 %v3257_v49 }
  0x40   :  { %1283 = vperm.xlu0 %3221, %v3321_v4   ;;  %v427_v4 = vrot.slane %v425_v2, 1 }
  0x42   :  { %759 = vrot.lane.b32.xlu1 %v750_v55, %s3256_s1  ;;  %v428_v7 = vsel %vm336_vm1, %v3459_v3, %v427_v4  ;;  %v431_v8 = vor.u32 %v429_v6, %v427_v4 }
  0x44   :  { %1294 = vperm.xlu0 %3221, %v3383_v20  }
  0x46   :  { %434 = vrot.lane.b32.xlu1 %v412_v60, %s3256_s1 }
  0x48   :  { %1327 = vperm.xlu0 %3221, %v3390_v21  }
  0x4a   :  { %436 = vrot.lane.b32.xlu1 %v3448_v63, %s3256_s1 }
  0x4e   :  { %1261 = vperm.xlu1 %3222, %v3326_v5  }
  0x52   :  { %1272 = vperm.xlu1 %3222, %v3374_v19   ;;  %v3473_v19 = vsub.s32 %v72_v15, %v3468_v16 }
  0x56   :  { %1305 = vperm.xlu1 %3222, %v3359_v17  }
  0x5a   :  { %438 = vrot.lane.b32.xlu1 %v428_v7, %s3256_s1 }
  0x5e   :  { %440 = vrot.lane.b32.xlu1 %v431_v8, %s3256_s1 }
  0x62   :  { %1316 = vperm.xlu1 %3222, %v3395_v22  }
  0x81   :  { %v230_v5 = vpop.permute.xlu1 %229  ;;  %v68_v9 = vpop.permute.xlu0 %67 }
  0x82   :  { %v76_v20 = vrot.slane %v68_v9, %v3473_v19  ;;  %v238_v32 = vrot.slane %v230_v5, %v3473_v19 }
  0x85   :  { %v241_v13 = vpop.permute.xlu1 %240  ;;  %v104_v14 = vpop.permute.xlu0 %103 }
  0x86   :  { %v112_v24 = vrot.slane %v104_v14, %v3473_v19  ;;  %v249_v26 = vrot.slane %v241_v13, %v3473_v19 }
  0x88   :  { %v2900_v34 = vcombine.low %v238_v32, %v249_v26 }
  0x89   :  { %v3470_v17 = vpop.permute.xlu1 %284  ;;  %v128_v18 = vpop.permute.xlu0 %127 }
  0x8a   :  { %v136_v41 = vrot.slane %v128_v18, %v3473_v19  ;;  %v3496_v46 = vshrl.u32 %v2900_v34, 16  ;;  %v3523_v5 = vshll.u32 %v2900_v34, 16  ;;  %v293_v18 = vrot.slane %v3470_v17, %v3473_v19 }
  0x8c   :  { %v684_v1 = vrot.slane %v3496_v46, 7 }
  0x8e   :  { %v252_v21 = vpop.permute.xlu0 %251  ;;  %v80_v22 = vpop.permute.xlu1 %79 }
  0x8f   :  { %v88_v23 = vrot.slane %v80_v22, %v3473_v19  ;;  %v260_v35 = vrot.slane %v252_v21, %v3473_v19 }
  0x91   :  { %v2896_v25 = vcombine.low %v76_v20, %v88_v23 }
  0x92   :  { %v263_v27 = vpop.permute.xlu0 %262  ;;  %v92_v28 = vpop.permute.xlu1 %91 }
  0x93   :  { %v3479_v29 = vshll.u32 %v2896_v25, 16  ;;  %v100_v31 = vrot.slane %v92_v28, %v3473_v19  ;;  %v271_v37 = vrot.slane %v263_v27, %v3473_v19  ;;  %v3499_v50 = vshrl.u32 %v2896_v25, 16 }
  0x95   :  { %v2897_v33 = vcombine.low %v100_v31, %v112_v24  ;;  %v3486_v40 = vrot.slane %v3479_v29, 1  ;;  %v2901_v47 = vcombine.low %v260_v35, %v271_v37  ;;  %v185_v2 = vrot.slane %v3499_v50, 1 }
  0x96   :  { %v274_v38 = vpop.permute.xlu0 %273  ;;  %v116_v39 = vpop.permute.xlu1 %115  ;;  %v188_v4 = vrot.slane %v3479_v29, 2  ;;  %v3548_v24 = vor.u32 %v684_v1, %v3523_v5 }
  0x97   :  { %v3489_v42 = vshll.u32 %v2897_v33, 16  ;;  %v124_v43 = vrot.slane %v116_v39, %v3473_v19  ;;  %v673_v44 = vmul.bf16 %v3486_v40, %v3403_v30  ;;  %v3494_v45 = vshrl.u32 %v2897_v33, 16 }
  0x98   :  { %v658_v61 = vor.u32 %v3486_v40, %v3499_v50  ;;  %v3513_v62 = vshrl.u32 %v2901_v47, 16  ;;  %v282_v9 = vrot.slane %v274_v38, %v3473_v19  ;;  %v3545_v23 = vor.u32 %v188_v4, %v185_v2  ;;  %4644 = vst [vmem:[#allocation6_spill] sm:$0xff] %v3548_v24 }
  0x99   :  { %710 = vrot.lane.b32.xlu0 %v673_v44, %s3259_s15  ;;  %v3501_v51 = vcombine.low %v124_v43, %v136_v41  ;;  %v659_v56 = vrot.slane %v3489_v42, 1  ;;  %v193_v58 = vrot.slane %v3494_v45, 1  ;;  %v196_v59 = vrot.slane %v3489_v42, 2 }
  0x9a   :  { %v307_v49 = vpop.permute.xlu0 %306  ;;  %v4618_v20 = vrot.slane %v3513_v62, 7  ;;  %v3552_v17 = vshll.u32 %v2901_v47, 16  ;;  %v2902_v26 = vcombine.low %v282_v9, %v293_v18  ;;  %v700_v44 = vmul.bf16 %v3548_v24, %v3411_v36 }
  0x9b   :  { %v315_v52 = vrot.slane %v307_v49, %v3473_v19  ;;  %v296_v53 = vpop.permute.xlu1 %295  ;;  %v3509_v60 = vshll.u32 %v3501_v51, 16  ;;  %v3519_v7 = vsel %vm336_vm1, %v658_v61, %v659_v56  ;;  %v661_v13 = vor.u32 %v659_v56, %v3494_v45 }
  0x9c   :  { %v304_v55 = vrot.slane %v296_v53, %v3473_v19  ;;  %4642 = vst [vmem:[#allocation4_spill] sm:$0xff] %v3519_v7  ;;  %v674_v10 = vmul.bf16 %v3519_v7, %v3411_v36  ;;  %v3532_v15 = vor.u32 %v196_v59, %v193_v58  ;;  %v687_v35 = vor.u32 %v4618_v20, %v3552_v17 }
  0x9d   :  { %v4621_v14 = vrot.slane %v3509_v60, 1  ;;  %v3573_v41 = vshrl.u32 %v2902_v26, 16  ;;  %v347_v2 = vrot.slane %v3552_v17, 1  ;;  %v3617_v18 = vrot.slane %v3523_v5, 1 }
  0x9e   :  { %v2903_v6 = vcombine.low %v304_v55, %v315_v52  ;;  %712 = vrot.lane.b32.xlu1 %v674_v10, %s3259_s15  ;;  %v3562_v34 = vsel %vm181_vm2, %v3545_v23, %v3532_v15  ;;  %v3586_v52 = vld [vmem:[#allocation2 + $0x20] sm:$0xff]  ;;  %v3590_v55 = vshll.u32 %v2902_v26, 16  ;;  %v3596_v58 = vsel %vm683_vm3, %v684_v1, %v687_v35 }
  0x9f   :  { %v3521_v8 = vpop.permute.xlu0 %500  ;;  %v3543_v22 = vsel %vm336_vm1, %v661_v13, %v4621_v14  ;;  %4645 = vst [vmem:[#allocation7_spill] sm:$0xff] %v3562_v34  ;;  %v223_v43 = vmul.bf16 %v3562_v34, %v3411_v36  ;;  %4648 = vst [vmem:[#allocation10_spill] sm:$0xff] %v3596_v58  ;;  %v4619_v4 = vrot.slane %v3573_v41, 7  ;;  %v701_v1 = vmul.bf16 %v3596_v58, %v3424_v48 }
  0xa0   :  { %v140_v11 = vpop.permute.xlu1 %139  ;;  %v3528_v12 = vshll.u32 %v2903_v6, 16  ;;  %v3537_v21 = vshrl.u32 %v2903_v6, 16  ;;  %4643 = vst [vmem:[#allocation5_spill] sm:$0xff] %v3543_v22  ;;  %v675_v27 = vmul.bf16 %v3543_v22, %v3424_v48  ;;  %v766_v6 = vrot.slane %v700_v44, 1  ;;  %v3633_v44 = vld [vmem:[#allocation2 + $0x28] sm:$0x1] }
  0xa1   :  { %v148_v32 = vrot.slane %v140_v11, %v3473_v19  ;;  %v351_v26 = vor.u32 %v3513_v62, %v347_v2  ;;  %v3636_v20 = vrot.slane %v701_v1, 1  ;;  %v3659_v34 = vshrl.u32 %v3501_v51, 16 }
  0xa2   :  { %v4622_v31 = vrot.slane %v3528_v12, 1  ;;  %v3568_v37 = vrot.slane %v3537_v21, 7  ;;  %714 = vrot.lane.b32.xlu1 %v675_v27, %s3259_s15  ;;  %v355_v27 = vrot.slane %v3590_v55, 1  ;;  %v4653_v51 = vrot.slane %v3528_v12, 1 }
  0xa3   :  { %v3550_v25 = vpop.permute.xlu0 %533  ;;  %v205_v58 = vrot.slane %v3509_v60, 2 }
  0xa4   :  { %v152_v28 = vpop.permute.xlu1 %151  ;;  %4646 = vst [vmem:[#allocation8_spill] sm:$0xff] %v3568_v37  ;;  %v3582_v47 = vor.u32 %v3537_v21, %v4622_v31  ;;  %v693_v56 = vor.u32 %v3568_v37, %v3528_v12  ;;  %v704_v1 = vmul.bf16 %v3568_v37, %v3633_v44  ;;  %v3671_v31 = vld [vmem:[#allocation2 + $0x8] sm:$0xfe] }
  0xa5   :  { %v160_v33 = vrot.slane %v152_v28, %v3473_v19 }
  0xa6   :  { %4647 = vst [vmem:[#allocation9_spill] sm:$0xff] %v3582_v47  ;;  %385 = vrot.lane.b32.xlu1 %v223_v43, %s3259_s15  ;;  %v377_v9 = vmul.bf16 %v3582_v47, %v3586_v52  ;;  %v3625_v28 = vsel %vm683_vm3, %v4619_v4, %v693_v56  ;;  %v64_v43 = vld [vmem:[#allocation2] sm:$0xc0] }
  0xa7   :  { %v2899_v38 = vcombine.low %v148_v32, %v160_v33  ;;  %v3571_v39 = vpop.permute.xlu0 %555  ;;  %4650 = vst [vmem:[#allocation12_spill] sm:$0xff] %v3625_v28  ;;  %v703_v56 = vmul.bf16 %v3625_v28, %v3586_v52  ;;  %v222_v14 = vmul.bf16 %v3545_v23, %v64_v43  ;;  %v359_v28 = vor.u32 %v3573_v41, %v355_v27 }
  0xa8   :  { %v768_v43 = vsel %vm447_vm4, %v766_v6, %v3636_v20 }
  0xa9   :  { %v3584_v49 = vshll.u32 %v2899_v38, 16  ;;  %v3588_v53 = vpop.permute.xlu1 %511  ;;  %v3598_v59 = vshrl.u32 %v2899_v38, 16  ;;  %v3631_v38 = vrot.slane %v377_v9, 1  ;;  %v3647_v9 = vsel %vm336_vm1, %v351_v26, %v355_v27 }
  0xaa   :  { %775 = vrot.lane.b32.xlu1 %v766_v6, %s3260_s16  ;;  %4651 = vst [vmem:[#allocation13_spill] sm:$0xff] %v3647_v9  ;;  %v773_v6 = vrot.slane %v704_v1, 1 }
  0xab   :  { %v4620_v61 = vrot.slane %v3584_v49, 1  ;;  %v3614_v13 = vpop.permute.xlu0 %753  ;;  %v211_v32 = vrot.slane %v3598_v59, 1  ;;  %v214_v33 = vrot.slane %v3584_v49, 2 }
  0xad   :  { %v3608_v10 = vor.u32 %v4620_v61, %v3598_v59  ;;  %v3612_v11 = vpop.permute.xlu1 %522  ;;  %v343_v61 = vor.u32 %v3496_v46, %v3617_v18 }
  0xae   :  { %465 = vrot.lane.b32.xlu1 %v3631_v38, %s3260_s16 }
  0xaf   :  { %4649 = vst [vmem:[#allocation11_spill] sm:$0xff] %v3608_v10  ;;  %v677_v35 = vmul.bf16 %v3608_v10, %v3586_v52  ;;  %v3655_v24 = vpop.permute.xlu0 %755  ;;  %v3662_v26 = vsel %vm336_vm1, %v343_v61, %v347_v2  ;;  %v3679_v61 = vsel %vm336_vm1, %v359_v28, %v4653_v51  ;;  %v1150_v2 = vshll.u32 %v3671_v31, 16 }
  0xb0   :  { %4652 = vst [vmem:[#allocation14_spill] sm:$0xff] %v3662_v26  ;;  %4654 = vst [vmem:[#allocation15_spill] sm:$0xff] %v3679_v61 }
  0xb1   :  { %718 = vrot.lane.b32.xlu0 %v677_v35, %s3259_s15  ;;  %v3640_v4 = vpop.permute.xlu1 %544  ;;  %v3652_v35 = vor.u32 %v214_v33, %v211_v32  ;;  %v3667_v32 = vrot.slane %v703_v56, 1  ;;  %v375_v33 = vmul.bf16 %v3647_v9, %v3424_v48  ;;  %v374_v56 = vmul.bf16 %v3662_v26, %v3411_v36 }
  0xb2   :  { %777 = vrot.lane.b32.xlu1 %v768_v43, %s3260_s16  ;;  %v4655_v9 = vrot.slane %v3499_v50, 7  ;;  %v202_v43 = vrot.slane %v3659_v34, 1 }
  0xb3   :  { %v774_v28 = vsel %vm447_vm4, %v3667_v32, %v773_v6  ;;  %v451_v1 = vrot.slane %v375_v33, 1  ;;  %v567_v26 = vpop.permute.xlu0 %566  ;;  %v3703_v22 = vrot.slane %v374_v56, 1  ;;  %v1148_v33 = vshrl.u32 %v3671_v31, 16 }
  0xb4   :  { %v3689_v37 = vor.u32 %v4655_v9, %v3479_v29  ;;  %v4657_v29 = vrot.slane %v3509_v60, 1  ;;  %v575_v7 = vrot.slane %v567_v26, %v3473_v19 }
  0xb5   :  { %383 = vrot.lane.b32.xlu0 %v222_v14, %s3259_s15  ;;  %v3673_v27 = vpop.permute.xlu1 %751  ;;  %v226_v14 = vmul.bf16 %v3652_v35, %v3453_v0  ;;  %v376_v0 = vmul.bf16 %v3679_v61, %v3432_v54  ;;  %v4658_v61 = vrot.slane %v3584_v49, 1  ;;  %v452_v56 = vsel %vm447_vm4, %v3703_v22, %v451_v1 }
  0xb6   :  { %4656 = vst [vmem:[#allocation16_spill] sm:$0xff] %v3689_v37  ;;  %783 = vrot.lane.b32.xlu1 %v774_v28, %s3260_s16  ;;  %v664_v9 = vor.u32 %v4657_v29, %v3659_v34  ;;  %v1101_v6 = vmul.bf16 %v3689_v37, %v3411_v36  ;;  %v206_v28 = vor.u32 %v205_v58, %v202_v43  ;;  %v4659_v29 = vrot.slane %v3573_v41, 7 }
  0xb7   :  { %v3720_v36 = vrot.slane %v376_v0, 1  ;;  %v1114_v37 = vrot.slane %v3573_v41, 6 }
  0xb8   :  { %v3711_v10 = vsel %vm336_vm1, %v664_v9, %v4658_v61  ;;  %v1115_v61 = vrot.slane %v3590_v55, 7  ;;  %v1110_v9 = vrot.slane %v3513_v62, 6  ;;  %v3735_v0 = vsel %vm181_vm2, %v3532_v15, %v206_v28  ;;  %v3223_v15 = vld [vmem:[%s4611_s2 + $0x14] sm:$0xff]  }
  0xb9   :  { %391 = vrot.lane.b32.xlu0 %v226_v14, %s3259_s15  ;;  %v578_v51 = vpop.permute.xlu1 %577  ;;  %v1152_v14 = vrot.slane %v1150_v2, 1  ;;  %v676_v26 = vmul.bf16 %v3711_v10, %v3432_v54  ;;  %v454_v41 = vsel %vm447_vm4, %v451_v1, %v3720_v36  ;;  %v1108_v1 = vrot.slane %v3523_v5, 7  ;;  %3036 = vmatprep.subr.bf16.mxu0 %v3223_v15 }
  0xba   :  { %v586_v47 = vrot.slane %v578_v51, %v3473_v19  ;;  %v690_v51 = vor.u32 %v4659_v29, %v3590_v55  ;;  %459 = vrot.lane.b32.xlu1 %v452_v56, %s3260_s16  ;;  %v1116_v29 = vor.u32 %v1115_v61, %v1114_v37  ;;  %v224_v56 = vmul.bf16 %v3735_v0, %v3424_v48  ;;  %v3225_v61 = vld [vmem:[%s4611_s2 + $0x24] ss:$0 sps:$4 sm:$0xff]  }
  0xbb   :  { %v1153_v43 = vor.u32 %v1152_v14, %v1148_v33  ;;  %v1107_v14 = vrot.slane %v3496_v46, 6  ;;  %v3766_v46 = vsel %vm181_vm2, %v206_v28, %v3652_v35  ;;  %3037 = vmatpush3.bf16.msra.mxu0 %v3223_v15 }
  0xbc   :  { %v3727_v58 = vcombine.low %v575_v7, %v586_v47  ;;  %v1171_v7 = vshll.u32 %v3586_v52, 16  ;;  %v4660_v47 = vrot.slane %v3513_v62, 7  ;;  %v1118_v62 = vrot.slane %v3537_v21, 6 }
  0xbd   :  { %1137 = vrot.lane.b32.xlu0 %v1101_v6, %s3259_s15  ;;  %v3722_v2 = vpop.permute.xlu1 %757  ;;  %v1111_v6 = vrot.slane %v3552_v17, 7  ;;  %v3748_v17 = vpop.permute.xlu0 %432  ;;  %v1119_v21 = vrot.slane %v3528_v12, 7  ;;  %v3778_v28 = vor.u32 %v1108_v1, %v1107_v14  ;;  %v225_v12 = vmul.bf16 %v3766_v46, %v3432_v54 }
  0xbe   :  { %v3744_v55 = vsel %vm683_vm3, %v4660_v47, %v690_v51  ;;  %461 = vrot.lane.b32.xlu1 %v454_v41, %s3260_s16  ;;  %v1158_v51 = vsel %vm336_vm1, %v1153_v43, %v3436_v57  ;;  %v3788_v41 = vrot.slane %v3598_v59, 7  ;;  %v3804_v59 = vld [vmem:[%s4611_s2] sm:$0xff]  }
  0xbf   :  { %v702_v5 = vmul.bf16 %v3744_v55, %v3432_v54  ;;  %v1112_v37 = vor.u32 %v1111_v6, %v1110_v9  ;;  %v3785_v9 = vrot.slane %v1171_v7, 1  ;;  %v877_v7 = vsel %vm875_vm6, %v3225_v61, 0 }
  0xc1   :  { %716 = vrot.lane.b32.xlu0 %v676_v26, %s3259_s15  ;;  %v3746_v33 = vpop.permute.xlu1 %759  ;;  %v3224_v26 = vld [vmem:[%s4611_s2 + $0x1c] sm:$0xff]   ;;  %v3781_v43 = vsel %vm4641_vm5, %v1112_v37, %v1116_v29  ;;  %v1251_v6 = vpop.permute.xlu0 %1250  ;;  %v769_v47 = vrot.slane %v702_v5, 1  ;;  %v3792_v15 = vsel %vm4641_vm5, %v3778_v28, %v1112_v37  ;;  %v1087_v5 = vrot.slane %v3494_v45, 7 }
  0xc2   :  { %3038 = vmatprep.subr.bf16.mxu0 %v3224_v26  ;;  %1185 = vrot.lane.b32.xlu1 %v1158_v51, %s3256_s1  ;;  %4661 = vst [vmem:[#allocation17_spill] sm:$0xff] %v3781_v43  ;;  %v1129_v14 = vmul.bf16 %v3781_v43, %v3432_v54  ;;  %v3808_v51 = vor.u32 %v1119_v21, %v1118_v62  ;;  %v1090_v45 = vrot.slane %v3659_v34, 7 }
  0xc3   :  { %3039 = vmatpush3.bf16.msra.mxu0 %v3224_v26  ;;  %v1128_v26 = vmul.bf16 %v3792_v15, %v3424_v48  ;;  %v770_v37 = vsel %vm447_vm4, %v3636_v20, %v769_v47  ;;  %v373_v62 = vmul.bf16 %v3617_v18, %v3403_v30  ;;  %v1106_v20 = vld [vmem:[#allocation2 + $0x28] sm:$0x3]  ;;  %v772_v30 = vsel %vm447_vm4, %v769_v47, %v3667_v32 }
  0xc4   :  { %3196 = vmatprep.subr.msk.bf16.mxu0 %vm875_vm6, %v3225_v61  ;;  %4662 = vst [vmem:[#allocation18_spill] sm:$0xff] %v3808_v51  ;;  %v1094_v61 = vor.u32 %v3788_v41, %v3584_v49  ;;  %v3830_v49 = vsel %vm4641_vm5, %v1116_v29, %v3808_v51 }
  0xc5   :  { %387 = vrot.lane.b32.xlu0 %v224_v56, %s3259_s15  ;;  %v3772_v57 = vpop.permute.xlu1 %434  ;;  %v1174_v56 = vsel %vm336_vm1, %v3459_v3, %v3785_v9  ;;  %v1284_v21 = vpop.permute.xlu0 %1283  ;;  %v448_v29 = vrot.slane %v373_v62, 1  ;;  %v4664_v62 = vrot.slane %v3499_v50, 7 }
  0xc6   :  { %1187 = vrot.lane.b32.xlu1 %v3448_v63, %s3256_s1  ;;  %v3821_v63 = vrot.slane %v1129_v14, 1  ;;  %v1259_v14 = vrot.slane %v1251_v6, %v3473_v19  ;;  %v1292_v34 = vrot.slane %v1284_v21, %v3473_v19  ;;  %v1130_v6 = vmul.bf16 %v3830_v49, %v3586_v52 }
  0xc7   :  { %3041 = vmatpush3.bf16.msra.mxu0 %v877_v7  ;;  %v1201_v7 = vrot.slane %v1128_v26, 1  ;;  %v1131_v26 = vmul.bf16 %v3808_v51, %v1106_v20  ;;  %v1091_v20 = vor.u32 %v1090_v45, %v3509_v60 }
  0xc8   :  { %3050 = vmatprep.subr.bf16.mxu0 %v3804_v59 }
  0xc9   :  { %389 = vrot.lane.b32.xlu0 %v225_v12, %s3259_s15  ;;  %v3797_v1 = vpop.permute.xlu1 %436  ;;  %v1204_v43 = vsel %vm447_vm4, %v1201_v7, %v3821_v63  ;;  %v1295_v21 = vpop.permute.xlu0 %1294  ;;  %v3869_v60 = vsel %vm683_vm3, %v1087_v5, %v1091_v20 }
  0xca   :  { %1189 = vrot.lane.b32.xlu1 %v1174_v56, %s3256_s1  ;;  %v1088_v56 = vor.u32 %v1087_v5, %v3489_v42  ;;  %v1103_v5 = vmul.bf16 %v3869_v60, %v3432_v54  ;;  %v456_v54 = vsel %vm447_vm4, %v3720_v36, %v3631_v38 }
  0xcd   :  { %779 = vrot.lane.b32.xlu0 %v770_v37, %s3260_s16  ;;  %v1262_v3 = vpop.permute.xlu1 %1261  ;;  %v3837_v37 = vsel %vm683_vm3, %v1090_v45, %v1094_v61  ;;  %v450_v61 = vsel %vm447_vm4, %v448_v29, %v3703_v22 }
  0xce   :  { %v1270_v12 = vrot.slane %v1262_v3, %v3473_v19  ;;  %4663 = vst [vmem:[#allocation19_spill] sm:$0xff] %v3837_v37  ;;  %1211 = vrot.lane.b32.xlu1 %v1204_v43, %s3260_s16  ;;  %v1104_v47 = vmul.bf16 %v3837_v37, %v3586_v52  ;;  %v1303_v43 = vrot.slane %v1295_v21, %v3473_v19 }
  0xd0   :  { %v3848_v32 = vcombine.low %v1259_v14, %v1270_v12  ;;  %v1205_v12 = vrot.slane %v1130_v6, 1  ;;  %v1207_v14 = vrot.slane %v1131_v26, 1  ;;  %v1183_v26 = vshrl.u32 %v3633_v44, 16 }
  0xd1   :  { %781 = vrot.lane.b32.xlu0 %v772_v30, %s3260_s16  ;;  %v1273_v3 = vpop.permute.xlu1 %1272  ;;  %v3858_v30 = vsel %vm683_vm3, %v4664_v62, %v1088_v56 }
  0xd2   :  { %v1281_v42 = vrot.slane %v1273_v3, %v3473_v19  ;;  %1143 = vrot.lane.b32.xlu1 %v1104_v47, %s3259_s15  ;;  %v1358_v22 = vshrl.u32 %v3848_v32, 16  ;;  %v1102_v56 = vmul.bf16 %v3858_v30, %v3424_v48  ;;  %v1208_v6 = vsel %vm447_vm4, %v1205_v12, %v1207_v14 }
  0xd4   :  { %v2928_v51 = vcombine.low %v1281_v42, %v1292_v34 }
  0xd5   :  { %457 = vrot.lane.b32.xlu0 %v450_v61, %s3260_s16  ;;  %v1306_v3 = vpop.permute.xlu1 %1305 }
  0xd6   :  { %v1365_v29 = vshrl.u32 %v2928_v51, 16  ;;  %v1368_v37 = vshll.u32 %v2928_v51, 16  ;;  %v1314_v50 = vrot.slane %v1306_v3, %v3473_v19  ;;  %1215 = vrot.lane.b32.xlu1 %v1208_v6, %s3260_s16  ;;  %v3877_v51 = vrot.slane %v1358_v22, 7  ;;  %v1328_v3 = vpop.permute.xlu0 %1327 }
  0xd7   :  { %v1336_v22 = vrot.slane %v1328_v3, %v3473_v19 }
  0xd8   :  { %v1367_v45 = vrot.slane %v1365_v29, 7  ;;  %v2929_v34 = vcombine.low %v1303_v43, %v1314_v50  ;;  %v1127_v43 = vmul.bf16 %v3778_v28, %v3671_v31  ;;  %v1179_v31 = vshll.u32 %v3633_v44, 16 }
  0xd9   :  { %1139 = vrot.lane.b32.xlu0 %v1102_v56, %s3259_s15  ;;  %v3874_v42 = vpop.permute.xlu1 %438 }
  0xda   :  { %v1370_v47 = vor.u32 %v1368_v37, %v1367_v45  ;;  %v1373_v61 = vshrl.u32 %v2929_v34, 16  ;;  %v1376_v48 = vshll.u32 %v2929_v34, 16  ;;  %1193 = vrot.lane.b32.xlu1 %v1183_v26, %s3256_s1  ;;  %v1200_v56 = vrot.slane %v1127_v43, 1 }
  0xdb   :  { %v1175_v34 = vshrl.u32 %v3586_v52, 16  ;;  %v1181_v36 = vrot.slane %v1179_v31, 1 }
  0xdc   :  { %v1375_v21 = vrot.slane %v1373_v61, 7  ;;  %v3883_v62 = vsel %vm683_vm3, %v3877_v51, %v1370_v47  ;;  %v1202_v26 = vsel %vm447_vm4, %v1200_v56, %v1201_v7 }
  0xdd   :  { %1141 = vrot.lane.b32.xlu0 %v1103_v5, %s3259_s15  ;;  %v3886_v20 = vpop.permute.xlu1 %440  ;;  %v1177_v38 = vor.u32 %v1175_v34, %v3785_v9  ;;  %v1105_v9 = vmul.bf16 %v3788_v41, %v3633_v44 }
  0xde   :  { %v1378_v37 = vor.u32 %v1376_v48, %v1375_v21  ;;  %v1206_v48 = vsel %vm447_vm4, %v3821_v63, %v1205_v12  ;;  %v3920_v63 = vld [vmem:[#allocation2] sm:$0x80] }
  0xdf   :  { %v1182_v52 = vsel %vm336_vm1, %v1177_v38, %v1181_v36  ;;  %v1975_v12 = vmul.bf16 %v3920_v63, %v3486_v40 }
  0xe0   :  { %v3896_v29 = vsel %vm683_vm3, %v1367_v45, %v1378_v37  ;;  %v1835_v37 = vld [vmem:[#allocation2] sm:$0xc0] }
  0xe1   :  { %463 = vrot.lane.b32.xlu0 %v456_v54, %s3260_s16  ;;  %v1317_v50 = vpop.permute.xlu1 %1316 }
  0xe2   :  { %v1325_v6 = vrot.slane %v1317_v50, %v3473_v19 }
  0xe4   :  { %v2930_v47 = vcombine.low %v1325_v6, %v1336_v22 }
  0xe5   :  { %1209 = vrot.lane.b32.xlu0 %v1202_v26, %s3260_s16 }
  0xe6   :  { %v1381_v45 = vshrl.u32 %v2930_v47, 16  ;;  %v1384_v61 = vshll.u32 %v2930_v47, 16 }
  0xe8   :  { %v3907_v5 = vrot.slane %v1381_v45, 7  ;;  %v520_v45 = vrot.slane %v3588_v53, %v3473_v19 }
  0xe9   :  { %1213 = vrot.lane.b32.xlu0 %v1206_v48, %s3260_s16 }
  0xea   :  { %v1386_v43 = vor.u32 %v1384_v61, %v3907_v5 }
  0xec   :  { %v3913_v7 = vsel %vm683_vm3, %v1375_v21, %v1386_v43  ;;  %v1836_v21 = vmul.bf16 %v1835_v37, %v3545_v23 }
  0xed   :  { %1191 = vrot.lane.b32.xlu0 %v1182_v52, %s3256_s1  ;;  %v531_v52 = vrot.slane %v3612_v11, %v3473_v19  ;;  %v564_v11 = vrot.slane %v3571_v39, %v3473_v19 }
  0xf1   :  { %1145 = vrot.lane.b32.xlu0 %v1105_v9, %s3259_s15 }
  0xf5   :  { %1217 = vrot.lane.b32.xlu0 %v1207_v14, %s3260_s16 }
  0xf9   :  { %1991 = vrot.lane.b32.xlu0 %v1975_v12, %s3259_s15 }
  0xfd   :  { %1852 = vrot.lane.b32.xlu0 %v1836_v21, %s3259_s15 }
 0x10b   :  { %v711_v44 = vpop.permute.xlu0 %710 }
 0x10c   :  { %v787_v40 = vsel %vm467_vm7, %v711_v44, %v3673_v27  ;;  %v509_v27 = vrot.slane %v3521_v8, %v3473_v19  ;;  %v553_v8 = vrot.slane %v3640_v4, %v3473_v19 }
 0x10e   :  { %v2904_v53 = vcombine.low %v509_v27, %v520_v45 }
 0x110   :  { %v713_v3 = vpop.permute.xlu1 %712  ;;  %v608_v44 = vshrl.u32 %v2904_v53, 16 }
 0x111   :  { %v790_v23 = vsel %vm467_vm7, %v713_v3, %v3614_v13  ;;  %v542_v13 = vrot.slane %v3550_v25, %v3473_v19 }
 0x113   :  { %v2905_v3 = vcombine.low %v531_v52, %v542_v13 }
 0x114   :  { %v715_v54 = vpop.permute.xlu1 %714 }
 0x118   :  { %v386_v22 = vpop.permute.xlu1 %385 }
 0x11c   :  { %v776_v50 = vpop.permute.xlu1 %775 }
 0x11d   :  { %v801_v34 = vsel %vm483_vm8, %v787_v40, %v776_v50  ;;  %v611_v50 = vshll.u32 %v2904_v53, 16  ;;  %v616_v40 = vshrl.u32 %v2905_v3, 16  ;;  %v473_v53 = vsel %vm467_vm7, %v386_v22, %v3772_v57 }
 0x11e   :  { %v816_v47 = vshrl.u32 %v801_v34, 16  ;;  %v619_v34 = vshll.u32 %v2905_v3, 16 }
 0x11f   :  { %v618_v45 = vrot.slane %v616_v40, 1 }
 0x120   :  { %v3927_v14 = vpop.permute.xlu1 %465  ;;  %v818_v43 = vrot.slane %v816_v47, 7  ;;  %v610_v47 = vrot.slane %v608_v44, 1  ;;  %v621_v27 = vrot.slane %v619_v34, 2 }
 0x123   :  { %v719_v56 = vpop.permute.xlu0 %718 }
 0x124   :  { %v778_v6 = vpop.permute.xlu1 %777  ;;  %v799_v40 = vsel %vm467_vm7, %v719_v56, %v3746_v33  ;;  %v634_v33 = vshrl.u32 %v3727_v58, 16  ;;  %v637_v56 = vshll.u32 %v3727_v58, 16 }
 0x125   :  { %v803_v26 = vsel %vm483_vm8, %v790_v23, %v778_v6  ;;  %v2906_v23 = vcombine.low %v553_v8, %v564_v11 }
 0x126   :  { %v819_v38 = vshrl.u32 %v803_v26, 16  ;;  %v822_v48 = vshll.u32 %v803_v26, 16 }
 0x127   :  { %v3932_v31 = vpop.permute.xlu0 %383  ;;  %v628_v4 = vshll.u32 %v2906_v23, 16 }
 0x128   :  { %v3943_v61 = vrot.slane %v819_v38, 7  ;;  %v784_v12 = vpop.permute.xlu1 %783  ;;  %v613_v38 = vrot.slane %v611_v50, 2  ;;  %v470_v58 = vsel %vm467_vm7, %v3932_v31, %v3748_v17 }
 0x129   :  { %v630_v39 = vrot.slane %v628_v4, 2 }
 0x12a   :  { %v824_v9 = vor.u32 %v822_v48, %v3943_v61  ;;  %v625_v48 = vshrl.u32 %v2906_v23, 16 }
 0x12b   :  { %v3937_v36 = vpop.permute.xlu0 %391 }
 0x12c   :  { %v825_v21 = vsel %vm683_vm3, %v818_v43, %v824_v9  ;;  %v460_v6 = vpop.permute.xlu1 %459  ;;  %v627_v19 = vrot.slane %v625_v48, 1  ;;  %v3960_v43 = vor.u32 %v613_v38, %v610_v47  ;;  %v622_v9 = vor.u32 %v621_v27, %v618_v45 }
 0x12d   :  { %3042 = vmatprep.mubr.msk.bf16.mxu0 %vm862_vm9, %v825_v21  ;;  %v793_v21 = vsel %vm467_vm7, %v715_v54, %v3655_v24  ;;  %v488_v8 = vsel %vm483_vm8, %v473_v53, %v460_v6  ;;  %v809_v54 = vsel %vm483_vm8, %v799_v40, %v784_v12  ;;  %v482_v40 = vsel %vm467_vm7, %v3937_v36, %v3886_v20 }
 0x12e   :  { %v3970_v50 = vor.u32 %v630_v39, %v627_v19  ;;  %v3976_v34 = vsel %vm181_vm2, %v3960_v43, %v622_v9  ;;  %v840_v45 = vshrl.u32 %v809_v54, 16  ;;  %v843_v31 = vshll.u32 %v809_v54, 16 }
 0x12f   :  { %v3950_v37 = vpop.permute.xlu0 %1137  ;;  %v648_v22 = vmul.bf16 %v3976_v34, %v488_v8  ;;  %v636_v8 = vrot.slane %v634_v33, 1 }
 0x130   :  { %v462_v52 = vpop.permute.xlu1 %461  ;;  %v3990_v12 = vsel %vm181_vm2, %v622_v9, %v3970_v50 }
 0x131   :  { %v954_v4 = vshrl.u32 %v648_v22, 16 }
 0x133   :  { %v717_v25 = vpop.permute.xlu0 %716 }
 0x134   :  { %v3978_v57 = vpop.permute.xlu1 %1185 }
 0x137   :  { %v388_v26 = vpop.permute.xlu0 %387 }
 0x138   :  { %v476_v11 = vsel %vm467_vm7, %v388_v26, %v3797_v1  ;;  %v796_v1 = vsel %vm467_vm7, %v717_v25, %v3722_v2  ;;  %v957_v2 = vshll.u32 %v648_v22, 16  ;;  %v1188_v19 = vpop.permute.xlu1 %1187  ;;  %v956_v22 = vrot.slane %v954_v4, 6 }
 0x139   :  { %v491_v23 = vsel %vm483_vm8, %v476_v11, %v462_v52  ;;  %v3227_v52 = vld [vmem:[%s4611_s2 + $0x8] sm:$0xff]  }
 0x13a   :  { %v649_v25 = vmul.bf16 %v3990_v12, %v491_v23  ;;  %v3228_v23 = vld [vmem:[%s4611_s2 + $0x10] ss:$0 sps:$4 sm:$0xff]  }
 0x13b   :  { %v3958_v13 = vpop.permute.xlu0 %389  ;;  %v1017_v4 = vsel %vm875_vm6, %v3228_v23, 0 }
 0x13c   :  { %v1190_v54 = vpop.permute.xlu1 %1189 }
 0x13f   :  { %v780_v3 = vpop.permute.xlu0 %779 }
 0x140   :  { %v805_v44 = vsel %vm483_vm8, %v793_v21, %v780_v3  ;;  %v639_v3 = vrot.slane %v637_v56, 2 }
 0x141   :  { %v826_v24 = vshrl.u32 %v805_v44, 16  ;;  %v829_v26 = vshll.u32 %v805_v44, 16  ;;  %v842_v44 = vrot.slane %v840_v45, 7 }
 0x143   :  { %v828_v6 = vrot.slane %v826_v24, 7  ;;  %v782_v47 = vpop.permute.xlu0 %781  ;;  %v845_v36 = vor.u32 %v843_v31, %v842_v44 }
 0x144   :  { %v807_v38 = vsel %vm483_vm8, %v796_v1, %v782_v47  ;;  %v959_v1 = vrot.slane %v957_v2, 7 }
 0x145   :  { %v831_v27 = vor.u32 %v829_v26, %v828_v6  ;;  %v833_v48 = vshrl.u32 %v807_v38, 16  ;;  %v836_v53 = vshll.u32 %v807_v38, 16  ;;  %v966_v26 = vshll.u32 %v649_v25, 16 }
 0x147   :  { %v835_v39 = vrot.slane %v833_v48, 7  ;;  %v458_v21 = vpop.permute.xlu0 %457  ;;  %v832_v9 = vsel %vm683_vm3, %v3943_v61, %v831_v27  ;;  %v963_v61 = vshrl.u32 %v649_v25, 16  ;;  %v4015_v27 = vor.u32 %v639_v3, %v636_v8 }
 0x148   :  { %v485_v11 = vsel %vm483_vm8, %v470_v58, %v458_v21  ;;  %3043 = vmatmul.mubr.msk.bf16.vlgmr.msra.gmra.mrb[0].mxu0 %vm862_vm9, %v832_v9  ;;  %v960_v48 = vor.u32 %v959_v1, %v956_v22  ;;  %v968_v25 = vrot.slane %v966_v26, 7  ;;  %v1361_v8 = vshll.u32 %v3848_v32, 16 }
 0x149   :  { %v838_v24 = vor.u32 %v836_v53, %v835_v39  ;;  %v647_v17 = vmul.bf16 %v3960_v43, %v485_v11  ;;  %3051 = vmatpush3.bf16.msra.mxu0 %v3804_v59  ;;  %v497_v59 = vsel %vm483_vm8, %v482_v40, %v3927_v14  ;;  %v965_v2 = vrot.slane %v963_v61, 6 }
 0x14a   :  { %3052 = vmatprep.subr.bf16.mxu0 %v3227_v52  ;;  %v846_v14 = vsel %vm683_vm3, %v835_v39, %v845_v36  ;;  %v651_v21 = vmul.bf16 %v4015_v27, %v497_v59  ;;  %v479_v11 = vsel %vm467_vm7, %v3958_v13, %v3874_v42  ;;  %v1212_v39 = vpop.permute.xlu1 %1211  ;;  %v4035_v44 = vsel %vm181_vm2, %v3970_v50, %v4015_v27  ;;  %v3230_v13 = vld [vmem:[%s4611_s2 + $0x30] sm:$0xff]   ;;  %v3231_v36 = vld [vmem:[%s4611_s2 + $0x38] ss:$0 sps:$4 sm:$0xff]  }
 0x14b   :  { %v946_v47 = vshrl.u32 %v647_v17, 16  ;;  %v949_v33 = vshll.u32 %v647_v17, 16  ;;  %v1140_v56 = vpop.permute.xlu0 %1139  ;;  %v839_v20 = vsel %vm683_vm3, %v828_v6, %v838_v24  ;;  %v3229_v6 = vld [vmem:[%s4611_s2 + $0x28] sm:$0xff]   ;;  %v969_v3 = vor.u32 %v968_v25, %v965_v2 }
 0x14c   :  { %3046 = vmatprep.mubr.msk.bf16.mxu0 %vm862_vm9, %v839_v20  ;;  %v981_v40 = vshrl.u32 %v651_v21, 16  ;;  %v984_v24 = vshll.u32 %v651_v21, 16  ;;  %v1221_v22 = vsel %vm467_vm7, %v3950_v37, %v3978_v57  ;;  %v4044_v42 = vor.u32 %v1361_v8, %v3877_v51 }
 0x14d   :  { %v948_v38 = vrot.slane %v946_v47, 6  ;;  %v951_v45 = vrot.slane %v949_v33, 7  ;;  %3053 = vmatpush3.bf16.msra.mxu0 %v3227_v52  ;;  %v1224_v52 = vsel %vm467_vm7, %v1140_v56, %v1188_v19  ;;  %v970_v26 = vsel %vm4641_vm5, %v960_v48, %v969_v3 }
 0x14e   :  { %3197 = vmatprep.subr.msk.bf16.mxu0 %vm875_vm6, %v3228_v23  ;;  %v1238_v17 = vsel %vm483_vm8, %v1224_v52, %v1212_v39  ;;  %v983_v47 = vrot.slane %v981_v40, 6  ;;  %v986_v33 = vrot.slane %v984_v24, 7  ;;  %v1144_v20 = vpop.permute.xlu1 %1143  ;;  %v1468_v52 = vsel %vm875_vm6, %v3231_v36, 0 }
 0x14f   :  { %v952_v58 = vor.u32 %v951_v45, %v948_v38  ;;  %v1142_v53 = vpop.permute.xlu0 %1141  ;;  %v1394_v50 = vmul.bf16 %v3883_v62, %v1238_v17 }
 0x150   :  { %3047 = vmatmul.mubr.msk.bf16.gmra.mrb[4].mxu0 %vm862_vm9, %v846_v14  ;;  %v1227_v38 = vsel %vm467_vm7, %v1142_v53, %v1190_v54  ;;  %v987_v25 = vor.u32 %v986_v33, %v983_v47 }
 0x151   :  { %v961_v9 = vsel %vm4641_vm5, %v952_v58, %v960_v48  ;;  %3055 = vmatpush3.bf16.msra.mxu0 %v1017_v4  ;;  %v1412_v59 = vshll.u32 %v1394_v50, 16 }
 0x152   :  { %3056 = vmatprep.mubr.msk.bf16.mxu0 %vm862_vm9, %v961_v9  ;;  %3064 = vmatprep.subr.bf16.mxu0 %v3229_v6  ;;  %v1216_v39 = vpop.permute.xlu1 %1215 }
 0x153   :  { %v464_v19 = vpop.permute.xlu0 %463  ;;  %v1414_v54 = vrot.slane %v1412_v59, 1 }
 0x154   :  { %v494_v32 = vsel %vm483_vm8, %v479_v11, %v464_v19 }
 0x155   :  { %v650_v31 = vmul.bf16 %v4035_v44, %v494_v32  ;;  %v1416_v32 = vshrl.u32 %v1394_v50, 16 }
 0x157   :  { %v972_v1 = vshrl.u32 %v650_v31, 16  ;;  %v975_v61 = vshll.u32 %v650_v31, 16  ;;  %v1210_v23 = vpop.permute.xlu0 %1209 }
 0x158   :  { %v1235_v56 = vsel %vm483_vm8, %v1221_v22, %v1210_v23  ;;  %3057 = vmatmul.mubr.msk.bf16.vlgmr.msra.gmra.mrb[0].mxu0 %vm862_vm9, %v970_v26 }
 0x159   :  { %v974_v37 = vrot.slane %v972_v1, 6  ;;  %v977_v51 = vrot.slane %v975_v61, 7  ;;  %v1393_v57 = vmul.bf16 %v4044_v42, %v1235_v56  ;;  %3065 = vmatpush3.bf16.msra.mxu0 %v3229_v6  ;;  %v1194_v1 = vpop.permute.xlu1 %1193  ;;  %v1418_v61 = vor.u32 %v1416_v32, %v1414_v54 }
 0x15a   :  { %3066 = vmatprep.subr.bf16.mxu0 %v3230_v13 }
 0x15b   :  { %v978_v45 = vor.u32 %v977_v51, %v974_v37  ;;  %v1407_v48 = vshll.u32 %v1393_v57, 16  ;;  %v1214_v4 = vpop.permute.xlu0 %1213  ;;  %v1405_v58 = vshrl.u32 %v1393_v57, 16 }
 0x15c   :  { %v1241_v2 = vsel %vm483_vm8, %v1227_v38, %v1214_v4  ;;  %v1598_v4 = vld [vmem:[%s4612_s5 + $0x8] sm:$0xff] }
 0x15d   :  { %v1409_v14 = vrot.slane %v1407_v48, 1  ;;  %v1395_v21 = vmul.bf16 %v3896_v29, %v1241_v2  ;;  %v979_v6 = vsel %vm4641_vm5, %v969_v3, %v978_v45  ;;  %3067 = vmatpush3.bf16.msra.mxu0 %v3230_v13  ;;  %v988_v11 = vsel %vm4641_vm5, %v978_v45, %v987_v25  ;;  %v1597_v48 = vld [vmem:[%s4612_s5] sm:$0xff]  ;;  %v1599_v2 = vld [vmem:[%s4612_s5 + $0x10] sm:$0xff] }
 0x15e   :  { %3060 = vmatprep.mubr.msk.bf16.mxu0 %vm862_vm9, %v979_v6  ;;  %3198 = vmatprep.subr.msk.bf16.mxu0 %vm875_vm6, %v3231_v36  ;;  %v3261_v45 = vmov 0.0|0.0   ;;  %v3263_v25 = vmov 0.0  }
 0x15f   :  { %v1410_v53 = vor.u32 %v1409_v14, %v1405_v58  ;;  %v1420_v9 = vshll.u32 %v1395_v21, 16  ;;  %v1192_v8 = vpop.permute.xlu0 %1191  ;;  %v1424_v22 = vshrl.u32 %v1395_v21, 16  ;;  %3152 = vmatprep.subr.bf16.mxu1 %v3261_v45  ;;  %3086 = vmatprep.mubr.msk.f32.mxu1 %vm4639_vm10, %v3263_v25  ;;  %v3153_v58 = vpack.c.bf16 %v1598_v4, %v1597_v48  ;;  %v1600_v14 = vld [vmem:[%s4612_s5 + $0x18] sm:$0xff] }
 0x160   :  { %v1230_v19 = vsel %vm467_vm7, %v1144_v20, %v1192_v8  ;;  %3061 = vmatmul.mubr.msk.bf16.gmra.mrb[4].mxu0 %vm862_vm9, %v988_v11  ;;  %v3156_v21 = vpack.c.bf16 %v1600_v14, %v1599_v2 }
 0x161   :  { %v1244_v3 = vsel %vm483_vm8, %v1230_v19, %v1216_v39  ;;  %v1415_v40 = vsel %vm336_vm1, %v1410_v53, %v1414_v54  ;;  %3069 = vmatpush3.bf16.msra.mxu0 %v1468_v52  ;;  %v1422_v24 = vrot.slane %v1420_v9, 1  ;;  %3154 = vmatpush3.bf16.msra.mxu1 %v3153_v58 }
 0x162   :  { %v1396_v17 = vmul.bf16 %v3913_v7, %v1244_v3  ;;  %3070 = vmatprep.mubr.msk.bf16.mxu0 %vm862_vm9, %v1415_v40  ;;  %3158 = vmatprep.subr.bf16.mxu0 %v3261_v45 }
 0x163   :  { %v1146_v31 = vpop.permute.xlu0 %1145  ;;  %v1426_v23 = vor.u32 %v1424_v22, %v1422_v24  ;;  %v1423_v56 = vsel %vm336_vm1, %v1418_v61, %v1422_v24  ;;  %3155 = vmatprep.subr.bf16.mxu1 %v3261_v45 }
 0x164   :  { %v1428_v13 = vshll.u32 %v1396_v17, 16  ;;  %v1233_v47 = vsel %vm467_vm7, %v1146_v31, %v1194_v1  ;;  %v1432_v57 = vshrl.u32 %v1396_v17, 16 }
 0x165   :  { %3157 = vmatpush3.bf16.msra.mxu1 %v3156_v21 }
 0x166   :  { %v1430_v26 = vrot.slane %v1428_v13, 1  ;;  %3089 = vmatprep.subr.mxu1 %v3263_v25 }
 0x167   :  { %v1218_v33 = vpop.permute.xlu0 %1217 }
 0x168   :  { %v1247_v37 = vsel %vm483_vm8, %v1233_v47, %v1218_v33  ;;  %3071 = vmatmul.mubr.msk.bf16.vlgmr.msra.gmra.mrb[0].mxu0 %vm862_vm9, %v1423_v56  ;;  %v1431_v51 = vsel %vm336_vm1, %v1426_v23, %v1430_v26  ;;  %v1434_v59 = vor.u32 %v1432_v57, %v1430_v26 }
 0x169   :  { %v1397_v50 = vmul.bf16 %v3907_v5, %v1247_v37  ;;  %3074 = vmatprep.mubr.msk.bf16.mxu0 %vm862_vm9, %v1431_v51 }
 0x16b   :  { %v1436_v20 = vshll.u32 %v1397_v50, 16 }
 0x16d   :  { %v1438_v36 = vrot.slane %v1436_v20, 1 }
 0x16f   :  { %v1439_v38 = vsel %vm336_vm1, %v1434_v59, %v1438_v36 }
 0x170   :  { %3075 = vmatmul.mubr.msk.bf16.gmra.mrb[4].mxu0 %vm862_vm9, %v1439_v38 }
 0x171   :  { %3144 = vmatprep.mubr.msk.f32.mxu0 %vm4639_vm10, %v3263_v25 }
 0x23b   :  { %v4100_v6 = vpop.f32.mrb[0].mxu0 }
 0x23c   :  { %v4102_v52 = vpop.f32.mrb[1].mxu0  ;;  %v1568_v8 = vmul.f32 %v4100_v6, %v4100_v6  ;;  %v1548_v40 = vsel %vm47_vm0, %v4100_v6, 0.0 }
 0x23d   :  { %v1566_v54 = vmul.f32 %v4102_v52, %v4102_v52  ;;  %v4106_v53 = vpop.f32.mrb[2].mxu0  ;;  %v1545_v11 = vsel %vm47_vm0, %v4102_v52, 0.0 }
 0x23e   :  { %v4108_v9 = vpop.f32.mrb[3].mxu0  ;;  %v1569_v17 = vmul.f32 %v4106_v53, %v4106_v53  ;;  %v1577_v13 = vsel %vm47_vm0, %v1568_v8, 0.0  ;;  %v1550_v1 = vsel %vm47_vm0, %v4106_v53, 0.0 }
 0x23f   :  { %v1546_v39 = vsel %vm47_vm0, %v4108_v9, 0.0  ;;  %v1567_v19 = vmul.f32 %v4108_v9, %v4108_v9  ;;  %v1574_v24 = vsel %vm47_vm0, %v1566_v54, 0.0 }
 0x240   :  { %v1547_v3 = vadd.f32 %v1546_v39, %v1545_v11  ;;  %v1579_v33 = vsel %vm47_vm0, %v1569_v17, 0.0 }
 0x241   :  { %v1575_v32 = vsel %vm47_vm0, %v1567_v19, 0.0 }
 0x242   :  { %v1549_v31 = vadd.f32 %v1548_v40, %v1547_v3  ;;  %v1576_v22 = vadd.f32 %v1575_v32, %v1574_v24 }
 0x243   :  { %v4127_v61 = vpop.f32.mrb[4].mxu0 }
 0x244   :  { %v1578_v23 = vadd.f32 %v1577_v13, %v1576_v22  ;;  %v4129_v26 = vpop.f32.mrb[5].mxu0  ;;  %v1551_v47 = vadd.f32 %v1550_v1, %v1549_v31  ;;  %v1572_v36 = vmul.f32 %v4127_v61, %v4127_v61  ;;  %v1556_v58 = vsel %vm47_vm0, %v4127_v61, 0.0 }
 0x245   :  { %v1552_v56 = vsel %vm47_vm0, %v4129_v26, 0.0  ;;  %v1570_v37 = vmul.f32 %v4129_v26, %v4129_v26  ;;  %v4136_v51 = vpop.f32.mrb[6].mxu0 }
 0x246   :  { %v1553_v50 = vadd.f32 %v1552_v56, %v1551_v47  ;;  %v1580_v57 = vadd.f32 %v1579_v33, %v1578_v23  ;;  %v4138_v20 = vpop.f32.mrb[7].mxu0  ;;  %v1573_v14 = vmul.f32 %v4136_v51, %v4136_v51  ;;  %v1585_v11 = vsel %vm47_vm0, %v1572_v36, 0.0  ;;  %v1696_v36 = vld [vmem:[%s4613_s6] sm:$0xf] }
 0x247   :  { %v1581_v59 = vsel %vm47_vm0, %v1570_v37, 0.0  ;;  %v1554_v38 = vsel %vm47_vm0, %v4138_v20, 0.0  ;;  %v1571_v48 = vmul.f32 %v4138_v20, %v4138_v20  ;;  %v1558_v39 = vsel %vm47_vm0, %v4136_v51, 0.0 }
 0x248   :  { %v1582_v4 = vadd.f32 %v1581_v59, %v1580_v57  ;;  %v1555_v2 = vadd.f32 %v1554_v38, %v1553_v50  ;;  %v1587_v40 = vsel %vm47_vm0, %v1573_v14, 0.0 }
 0x249   :  { %v1583_v21 = vsel %vm47_vm0, %v1571_v48, 0.0 }
 0x24a   :  { %v1557_v54 = vadd.f32 %v1556_v58, %v1555_v2  ;;  %v1584_v8 = vadd.f32 %v1583_v21, %v1582_v4 }
 0x24c   :  { %v1559_v19 = vadd.f32 %v1558_v39, %v1557_v54  ;;  %v1586_v3 = vadd.f32 %v1585_v11, %v1584_v8  ;;  %v1543_v54 = vld [vmem:[%s4614_s4] sm:$0x1] }
 0x24d   :  { %v1684_v8 = vrot.slane %v1543_v54, 7 }
 0x24e   :  { %v1560_v24 = vrot.slane %v1559_v19, 4  ;;  %v1588_v17 = vadd.f32 %v1587_v40, %v1586_v3  ;;  %v1544_v3 = vld [vmem:[%s4614_s4 + $0x1] sm:$0x1] }
 0x250   :  { %v1561_v32 = vadd.f32 %v1560_v24, %v1559_v19  ;;  %v1589_v31 = vrot.slane %v1588_v17, 4 }
 0x252   :  { %v1562_v22 = vrot.slane %v1561_v32, 2  ;;  %v1590_v13 = vadd.f32 %v1589_v31, %v1588_v17  ;;  %v1775_v31 = vsub.s32 0, %v3468_v16 }
 0x254   :  { %v1563_v1 = vadd.f32 %v1562_v22, %v1561_v32  ;;  %v1591_v23 = vrot.slane %v1590_v13, 2  ;;  %v1787_v22 = vsub.s32 1, %v3468_v16 }
 0x256   :  { %v1564_v47 = vrot.slane %v1563_v1, 1  ;;  %v1592_v33 = vadd.f32 %v1591_v23, %v1590_v13 }
 0x258   :  { %v1593_v56 = vrot.slane %v1592_v33, 1  ;;  %v1565_v37 = vadd.f32 %v1564_v47, %v1563_v1 }
 0x25a   :  { %v1594_v50 = vadd.f32 %v1593_v56, %v1592_v33  ;;  %v1805_v33 = vstv %s4615_s7 }
 0x25c   :  { %v1596_v57 = vsel %vm4640_vm11, %v1565_v37, %v1594_v50 }
 0x25d   :  { %3087 = vmatmul.mubr.msk.f32.vlgmr.msra.gmra.mrb[0].mxu1 %vm47_vm0, %v1596_v57 }
 0x25e   :  { %3091 = vmatprep.mubr.msk.f32.mxu1 %vm4639_vm10, %v3263_v25  ;;  %3090 = vmatpush3.msk.msra.mxu1 %vm875_vm6, %v1696_v36 }
 0x330   :  { %v1670_v59 = vpop.f32.mrb[0].mxu1 }
 0x331   :  { %v1674_v38 = vmul.f32 0.001953125, %v1670_v59  ;;  %v3088_v48 = vpop.f32.mrb[1].mxu1 }
 0x333   :  { %v1675_v4 = vmul.f32 %v1674_v38, %v1674_v38 }
 0x335   :  { %v1677_v2 = vrot.slane %v1675_v4, 7 }
 0x337   :  { %v1679_v58 = vsub.f32 %v1674_v38, %v1677_v2 }
 0x339   :  { %v1680_v14 = vmax.f32 %v1679_v58, 0.0 }
 0x33b   :  { %v1681_v21 = vadd.f32 1e-05, %v1680_v14 }
 0x33d   :  { %3241 = vrsqrt.f32 %v1681_v21 }
 0x347   :  { %v3242_v11 = vpop.eup %3241 }
 0x348   :  { %v1686_v39 = vmul.f32 %v3242_v11, %v1684_v8 }
 0x34a   :  { %v1688_v19 = vrot.slane %v1686_v39, 1 }
 0x34c   :  { %v1690_v40 = vmul.f32 %v1688_v19, %v1674_v38 }
 0x34e   :  { %v1691_v24 = vsub.f32 %v1544_v3, %v1690_v40 }
 0x350   :  { %v1693_v17 = vrot.slane %v1691_v24, 7 }
 0x352   :  { %v1695_v32 = vsel %vm4640_vm11, %v1688_v19, %v1693_v17 }
 0x353   :  { %3092 = vmatmul.mubr.msk.f32.vlgmr.msra.gmra.mrb[2].mxu1 %vm467_vm7, %v1695_v32 }
 0x426   :  { %v1769_v13 = vpop.f32.mrb[2].mxu1 }
 0x427   :  { %v1776_v1 = vrot.slane %v1769_v13, %v1775_v31  ;;  %v3093_v23 = vpop.f32.mrb[3].mxu1  ;;  %v1788_v47 = vrot.slane %v1769_v13, %v1787_v22 }
 0x429   :  { %v1777_v56 = vmul.f32 %v1776_v1, %v4102_v52  ;;  %v1778_v37 = vmul.f32 %v1776_v1, %v4108_v9  ;;  %v1779_v50 = vmul.f32 %v4100_v6, %v1776_v1  ;;  %v1780_v57 = vmul.f32 %v4106_v53, %v1776_v1 }
 0x42a   :  { %v1783_v36 = vmul.f32 %v4127_v61, %v1776_v1  ;;  %v1784_v59 = vmul.f32 %v4136_v51, %v1776_v1  ;;  %v1781_v38 = vmul.f32 %v1776_v1, %v4129_v26  ;;  %v1782_v48 = vmul.f32 %v1776_v1, %v4138_v20 }
 0x42b   :  { %v1789_v4 = vadd.f32 %v1788_v47, %v1777_v56  ;;  %v1790_v2 = vadd.f32 %v1788_v47, %v1778_v37  ;;  %v1791_v58 = vadd.f32 %v1788_v47, %v1779_v50  ;;  %v1792_v14 = vadd.f32 %v1788_v47, %v1780_v57 }
 0x42c   :  { %v1795_v21 = vadd.f32 %v1788_v47, %v1783_v36  ;;  %v1796_v52 = vadd.f32 %v1788_v47, %v1784_v59  ;;  %v1793_v54 = vadd.f32 %v1788_v47, %v1781_v38  ;;  %v1794_v9 = vadd.f32 %v1788_v47, %v1782_v48 }
 0x42d   :  { %vm1797_vm12 = vcmp.gt.f32.partialorder %v1789_v4, 0.0  ;;  %vm1798_vm13 = vcmp.gt.f32.partialorder %v1790_v2, 0.0  ;;  %v1806_v6 = vmul.f32 %v1805_v33, %v1789_v4  ;;  %v1807_v53 = vmul.f32 %v1805_v33, %v1790_v2 }
 0x42e   :  { %vm1799_vm14 = vcmp.gt.f32.partialorder %v1791_v58, 0.0  ;;  %vm1800_vm15 = vcmp.gt.f32.partialorder %v1792_v14, 0.0  ;;  %v1808_v61 = vmul.f32 %v1805_v33, %v1791_v58  ;;  %v1809_v51 = vmul.f32 %v1805_v33, %v1792_v14 }
 0x42f   :  { %v1814_v8 = vsel %vm1797_vm12, %v1789_v4, %v1806_v6  ;;  %v1815_v26 = vsel %vm1798_vm13, %v1790_v2, %v1807_v53  ;;  %vm1803_vm2 = vcmp.gt.f32.partialorder %v1795_v21, 0.0  ;;  %vm1804_vm10 = vcmp.gt.f32.partialorder %v1796_v52, 0.0 }
 0x430   :  { %v1822_v20 = vpack.c.bf16 %v1815_v26, %v1814_v8  ;;  %v1816_v11 = vsel %vm1799_vm14, %v1791_v58, %v1808_v61  ;;  %v1817_v39 = vsel %vm1800_vm15, %v1792_v14, %v1809_v51  ;;  %v1812_v19 = vmul.f32 %v1805_v33, %v1795_v21 }
 0x431   :  { %v1823_v3 = vpack.c.bf16 %v1817_v39, %v1816_v11  ;;  %v1813_v40 = vmul.f32 %v1805_v33, %v1796_v52  ;;  %vm1801_vm11 = vcmp.gt.f32.partialorder %v1793_v54, 0.0  ;;  %vm1802_vm5 = vcmp.gt.f32.partialorder %v1794_v9, 0.0  ;;  %v4665_v11 = vld [vmem:[#allocation4_spill] sm:$0xff] }
 0x432   :  { %v2002_v24 = vshll.u32 %v1822_v20, 16  ;;  %1826 = vst.msk [vmem:[#allocation2 + $0x8] sm:$0xff] %vm47_vm0, %v1822_v20  ;;  %v1820_v17 = vsel %vm1803_vm2, %v1795_v21, %v1812_v19  ;;  %v1810_v32 = vmul.f32 %v1805_v33, %v1793_v54  ;;  %v1811_v23 = vmul.f32 %v1805_v33, %v1794_v9 }
 0x433   :  { %1827 = vst.msk [vmem:[#allocation2 + $0x10] sm:$0xff] %vm47_vm0, %v1823_v3  ;;  %v2009_v13 = vshll.u32 %v1823_v3, 16  ;;  %v1821_v1 = vsel %vm1804_vm10, %v1796_v52, %v1813_v40  ;;  %v2005_v56 = vshrl.u32 %v1822_v20, 16  ;;  %v2013_v4 = vshrl.u32 %v1823_v3, 16  ;;  %v4666_v3 = vld [vmem:[#allocation11_spill] sm:$0xff] }
 0x434   :  { %v2004_v47 = vrot.slane %v2002_v24, 1  ;;  %v1825_v37 = vpack.c.bf16 %v1821_v1, %v1820_v17  ;;  %v1818_v50 = vsel %vm1801_vm11, %v1793_v54, %v1810_v32  ;;  %v1819_v36 = vsel %vm1802_vm5, %v1794_v9, %v1811_v23  ;;  %v4667_v24 = vld [vmem:[#allocation5_spill] sm:$0xff]  ;;  %v4669_v1 = vld [vmem:[#allocation10_spill] sm:$0xff] }
 0x435   :  { %v2011_v57 = vrot.slane %v2009_v13, 1  ;;  %v1824_v48 = vpack.c.bf16 %v1819_v36, %v1818_v50  ;;  %v4668_v32 = vld [vmem:[#allocation9_spill] sm:$0xff]  ;;  %v1865_v50 = vshll.u32 %v3920_v63, 16 }
 0x436   :  { %2032 = vrot.lane.b32.xlu1 %v2004_v47, %s3256_s1  ;;  %v2007_v59 = vor.u32 %v2005_v56, %v2004_v47  ;;  %1829 = vst.msk [vmem:[#allocation2 + $0x20] sm:$0xff] %vm47_vm0, %v1825_v37  ;;  %v2025_v38 = vshll.u32 %v1825_v37, 16  ;;  %v2029_v2 = vshrl.u32 %v1825_v37, 16  ;;  %v4670_v56 = vld [vmem:[#allocation7_spill] sm:$0xff] }
 0x437   :  { %1828 = vst.msk [vmem:[#allocation2 + $0x18] sm:$0xff] %vm47_vm0, %v1824_v48  ;;  %v2015_v33 = vor.u32 %v2013_v4, %v2011_v57  ;;  %v2017_v21 = vshll.u32 %v1824_v48, 16  ;;  %v2021_v9 = vshrl.u32 %v1824_v48, 16  ;;  %v1863_v4 = vshrl.u32 %v3920_v63, 16 }
 0x438   :  { %v2012_v58 = vsel %vm336_vm1, %v2007_v59, %v2011_v57  ;;  %v2027_v14 = vrot.slane %v2025_v38, 1  ;;  %v4671_v57 = vld [vmem:[#allocation12_spill] sm:$0xff] }
 0x439   :  { %2034 = vrot.lane.b32.xlu0 %v2012_v58, %s3256_s1  ;;  %v2019_v54 = vrot.slane %v2017_v21, 1  ;;  %v4202_v8 = vld [vmem:[#allocation2 + $0x8] sm:$0xff] }
 0x43a   :  { %v2031_v52 = vor.u32 %v2029_v2, %v2027_v14  ;;  %v1976_v39 = vmul.bf16 %v4202_v8, %v4665_v11  ;;  %v4212_v19 = vld [vmem:[#allocation2 + $0x10] sm:$0xff]  ;;  %v1837_v37 = vmul.bf16 %v4202_v8, %v4670_v56  ;;  %v1867_v2 = vrot.slane %v1865_v50, 1 }
 0x43b   :  { %v2020_v6 = vsel %vm336_vm1, %v2015_v33, %v2019_v54  ;;  %v2023_v53 = vor.u32 %v2021_v9, %v2019_v54  ;;  %v1977_v17 = vmul.bf16 %v4212_v19, %v4667_v24  ;;  %v1982_v23 = vmul.bf16 %v4212_v19, %v4669_v1  ;;  %v3232_v33 = vld [vmem:[%s4616_s3 + $0x14] sm:$0xff]   ;;  %v3233_v9 = vld [vmem:[%s4616_s3 + $0x1c] sm:$0xff]  }
 0x43c   :  { %2040 = vrot.lane.b32.xlu1 %v2031_v52, %s3256_s1  ;;  %v1870_v58 = vshll.u32 %v4202_v8, 16  ;;  %3094 = vmatprep.subr.bf16.mxu1 %v3232_v33  ;;  %v4672_v52 = vld [vmem:[#allocation6_spill] sm:$0xff] }
 0x43d   :  { %2036 = vrot.lane.b32.xlu0 %v2020_v6, %s3256_s1  ;;  %v2028_v61 = vsel %vm336_vm1, %v2023_v53, %v2027_v14  ;;  %v4207_v20 = vld [vmem:[#allocation2 + $0x20] sm:$0xff]  ;;  %v2048_v59 = vrot.slane %v1982_v23, 1  ;;  %v1981_v54 = vmul.bf16 %v4202_v8, %v4672_v52  ;;  %3095 = vmatpush3.bf16.msra.mxu1 %v3232_v33  ;;  %v1868_v53 = vor.u32 %v1867_v2, %v1863_v4  ;;  %v4676_v23 = vld [vmem:[#allocation15_spill] sm:$0xff] }
 0x43e   :  { %v4200_v51 = vld [vmem:[#allocation2 + $0x18] sm:$0xff]  ;;  %v1979_v40 = vmul.bf16 %v4207_v20, %v4666_v3  ;;  %v1846_v13 = vmul.bf16 %v4207_v20, %v4668_v32  ;;  %v1984_v36 = vmul.bf16 %v4207_v20, %v4671_v57  ;;  %v1834_v48 = vld [vmem:[#allocation2 + $0x20] sm:$0x7f]  ;;  %3096 = vmatprep.subr.bf16.mxu1 %v3233_v9  ;;  %v1842_v3 = vmul.bf16 %v3920_v63, %v3617_v18 }
 0x43f   :  { %v1978_v26 = vmul.bf16 %v4200_v51, %v3711_v10  ;;  %v1838_v10 = vmul.bf16 %v4212_v19, %v3735_v0  ;;  %v1983_v47 = vmul.bf16 %v4200_v51, %v3744_v55  ;;  %v1839_v55 = vmul.bf16 %v4200_v51, %v3766_v46 }
 0x440   :  { %2038 = vrot.lane.b32.xlu1 %v2028_v61, %s3256_s1  ;;  %v4236_v0 = vrot.slane %v1846_v13, 1  ;;  %v2052_v14 = vrot.slane %v1984_v36, 1  ;;  %v1840_v46 = vmul.bf16 %v1834_v48, %v3652_v35  ;;  %v1872_v61 = vrot.slane %v1870_v58, 1  ;;  %v4675_v13 = vld [vmem:[#allocation13_spill] sm:$0xff] }
 0x441   :  { %1997 = vrot.lane.b32.xlu0 %v1978_v26, %s3259_s15  ;;  %v2050_v38 = vrot.slane %v1983_v47, 1  ;;  %v4673_v26 = vld [vmem:[#allocation14_spill] sm:$0xff]  ;;  %v2047_v35 = vrot.slane %v1981_v54, 1  ;;  %3097 = vmatpush3.bf16.msra.mxu1 %v3233_v9  ;;  %v1844_v1 = vmul.bf16 %v4212_v19, %v4675_v13  ;;  %v1845_v47 = vmul.bf16 %v4200_v51, %v4676_v23 }
 0x442   :  { %v1843_v11 = vmul.bf16 %v4202_v8, %v4673_v26  ;;  %v1916_v56 = vrot.slane %v1842_v3, 1  ;;  %v2370_v33 = vmul.bf16 %v4212_v19, %v3792_v15  ;;  %v1878_v52 = vshll.u32 %v4212_v19, 16 }
 0x443   :  { %v2051_v21 = vsel %vm447_vm4, %v2048_v59, %v2050_v38  ;;  %v2053_v6 = vsel %vm447_vm4, %v2050_v38, %v2052_v14  ;;  %v2049_v63 = vsel %vm447_vm4, %v2047_v35, %v2048_v59  ;;  %v1919_v36 = vrot.slane %v1844_v1, 1 }
 0x444   :  { %1993 = vrot.lane.b32.xlu1 %v1976_v39, %s3259_s15  ;;  %v4260_v39 = vld [vmem:[#allocation2 + $0x28] sm:$0x1]  ;;  %v1917_v32 = vrot.slane %v1843_v11, 1  ;;  %v1921_v38 = vrot.slane %v1845_v47, 1  ;;  %v2426_v9 = vrot.slane %v2370_v33, 1  ;;  %v1880_v26 = vrot.slane %v1878_v52, 1 }
 0x445   :  { %1999 = vrot.lane.b32.xlu0 %v1979_v40, %s3259_s15  ;;  %v4674_v40 = vld [vmem:[#allocation8_spill] sm:$0xff]  ;;  %v2372_v13 = vmul.bf16 %v4207_v20, %v3830_v49  ;;  %v4679_v33 = vld [vmem:[#allocation19_spill] sm:$0xff] }
 0x446   :  { %v1985_v24 = vmul.bf16 %v4260_v39, %v4674_v40  ;;  %v1918_v50 = vsel %vm447_vm4, %v1916_v56, %v1917_v32  ;;  %v1922_v59 = vsel %vm447_vm4, %v1919_v36, %v1921_v38  ;;  %v1924_v15 = vsel %vm447_vm4, %v1921_v38, %v4236_v0 }
 0x448   :  { %1995 = vrot.lane.b32.xlu1 %v1977_v17, %s3259_s15  ;;  %v3234_v17 = vld [vmem:[%s4616_s3 + $0x24] ss:$0 sps:$4 sm:$0xff]   ;;  %v2054_v57 = vrot.slane %v1985_v24, 1 }
 0x449   :  { %1856 = vrot.lane.b32.xlu0 %v1838_v10, %s3259_s15  ;;  %v1873_v10 = vsel %vm336_vm1, %v1868_v53, %v1872_v61  ;;  %3199 = vmatprep.subr.msk.bf16.mxu1 %vm875_vm6, %v3234_v17  ;;  %v2156_v18 = vsel %vm875_vm6, %v3234_v17, 0  ;;  %v1886_v53 = vshll.u32 %v4200_v51, 16  ;;  %v1890_v17 = vshrl.u32 %v4200_v51, 16 }
 0x44a   :  { %3099 = vmatpush3.bf16.msra.mxu1 %v2156_v18  ;;  %v2055_v4 = vsel %vm447_vm4, %v2052_v14, %v2054_v57  ;;  %v2398_v57 = vshll.u32 %v4207_v20, 16 }
 0x44b   :  { %v1888_v3 = vrot.slane %v1886_v53, 1 }
 0x44c   :  { %1854 = vrot.lane.b32.xlu1 %v1837_v37, %s3259_s15  ;;  %v1894_v37 = vshll.u32 %v1834_v48, 16 }
 0x44d   :  { %1933 = vrot.lane.b32.xlu0 %v4236_v0, %s3260_s16  ;;  %v2365_v0 = vmul.bf16 %v4200_v51, %v3869_v60  ;;  %v4678_v60 = vld [vmem:[#allocation16_spill] sm:$0xff] }
 0x44e   :  { %v1896_v2 = vrot.slane %v1894_v37, 1 }
 0x450   :  { %1858 = vrot.lane.b32.xlu1 %v1839_v55, %s3259_s15  ;;  %v2362_v55 = vld [vmem:[#allocation2 + $0x8] sm:$0xfe] }
 0x451   :  { %2060 = vrot.lane.b32.xlu0 %v2051_v21, %s3260_s16  ;;  %v2369_v58 = vmul.bf16 %v2362_v55, %v3778_v28  ;;  %v1898_v21 = vshrl.u32 %v1834_v48, 16  ;;  %v4298_v28 = vld [vmem:[%s4616_s3] sm:$0xff]   ;;  %v2392_v1 = vshll.u32 %v2362_v55, 16  ;;  %v2390_v37 = vshrl.u32 %v2362_v55, 16 }
 0x452   :  { %3108 = vmatprep.subr.bf16.mxu1 %v4298_v28 }
 0x453   :  { %v1900_v14 = vor.u32 %v1898_v21, %v1896_v2  ;;  %v2425_v54 = vrot.slane %v2369_v58, 1  ;;  %v2394_v56 = vrot.slane %v2392_v1, 1  ;;  %v2366_v21 = vmul.bf16 %v4207_v20, %v4679_v33 }
 0x454   :  { %1860 = vrot.lane.b32.xlu1 %v1840_v46, %s3259_s15  ;;  %v1920_v46 = vsel %vm447_vm4, %v1917_v32, %v1919_v36  ;;  %v2364_v36 = vmul.bf16 %v4212_v19, %v3858_v30 }
 0x455   :  { %2062 = vrot.lane.b32.xlu0 %v2053_v6, %s3260_s16  ;;  %v1874_v6 = vshrl.u32 %v4202_v8, 16  ;;  %v2427_v11 = vsel %vm447_vm4, %v2425_v54, %v2426_v9 }
 0x457   :  { %v1876_v48 = vor.u32 %v1874_v6, %v1872_v61  ;;  %v1892_v61 = vor.u32 %v1890_v17, %v1888_v3  ;;  %v1992_v6 = vpop.permute.xlu0 %1991 }
 0x458   :  { %2056 = vrot.lane.b32.xlu1 %v2047_v35, %s3260_s16  ;;  %v1882_v35 = vshrl.u32 %v4212_v19, 16  ;;  %v2368_v19 = vld [vmem:[#allocation2 + $0x28] sm:$0x3] }
 0x459   :  { %1901 = vrot.lane.b32.xlu0 %v1873_v10, %s3256_s1  ;;  %v1881_v40 = vsel %vm336_vm1, %v1876_v48, %v1880_v26  ;;  %v4677_v10 = vld [vmem:[#allocation17_spill] sm:$0xff]  ;;  %v1897_v47 = vsel %vm336_vm1, %v1892_v61, %v1896_v2  ;;  %v2402_v2 = vshrl.u32 %v4207_v20, 16  ;;  %v2410_v20 = vshrl.u32 %v4260_v39, 16 }
 0x45a   :  { %v1884_v24 = vor.u32 %v1882_v35, %v1880_v26  ;;  %v2371_v32 = vmul.bf16 %v4200_v51, %v4677_v10  ;;  %v2363_v51 = vmul.bf16 %v4202_v8, %v4678_v60  ;;  %v2406_v8 = vshll.u32 %v4260_v39, 16 }
 0x45b   :  { %v1853_v53 = vpop.permute.xlu0 %1852 }
 0x45c   :  { %2058 = vrot.lane.b32.xlu1 %v2049_v63, %s3260_s16  ;;  %v1889_v23 = vsel %vm336_vm1, %v1884_v24, %v1888_v3  ;;  %v2428_v18 = vrot.slane %v2371_v32, 1  ;;  %v2430_v63 = vrot.slane %v2372_v13, 1  ;;  %v2408_v30 = vrot.slane %v2406_v8, 1 }
 0x45d   :  { %1925 = vrot.lane.b32.xlu0 %v1918_v50, %s3260_s16  ;;  %v2395_v50 = vor.u32 %v2394_v56, %v2390_v37 }
 0x45e   :  { %v2431_v49 = vsel %vm447_vm4, %v2428_v18, %v2430_v63  ;;  %v2429_v55 = vsel %vm447_vm4, %v2426_v9, %v2428_v18 }
 0x45f   :  { %v2396_v38 = vsel %vm336_vm1, %v2395_v50, %v1880_v26 }
 0x460   :  { %2064 = vrot.lane.b32.xlu1 %v2055_v4, %s3260_s16  ;;  %v2400_v4 = vrot.slane %v2398_v57, 1 }
 0x461   :  { %1929 = vrot.lane.b32.xlu0 %v1922_v59, %s3260_s16  ;;  %v2367_v59 = vmul.bf16 %v4260_v39, %v3788_v41 }
 0x462   :  { %v2404_v58 = vor.u32 %v2402_v2, %v2400_v4  ;;  %v2401_v54 = vsel %vm336_vm1, %v1892_v61, %v2400_v4 }
 0x464   :  { %1927 = vrot.lane.b32.xlu1 %v1920_v46, %s3260_s16  ;;  %v4680_v46 = vld [vmem:[#allocation18_spill] sm:$0xff] }
 0x465   :  { %1909 = vrot.lane.b32.xlu0 %v1900_v14, %s3256_s1  ;;  %v2373_v52 = vmul.bf16 %v2368_v19, %v4680_v46  ;;  %v2409_v14 = vsel %vm336_vm1, %v2404_v58, %v2408_v30 }
 0x467   :  { %v2432_v41 = vrot.slane %v2373_v52, 1 }
 0x468   :  { %1931 = vrot.lane.b32.xlu1 %v1924_v15, %s3260_s16 }
 0x469   :  { %2434 = vrot.lane.b32.xlu0 %v2427_v11, %s3260_s16  ;;  %v2433_v9 = vsel %vm447_vm4, %v2430_v63, %v2432_v41 }
 0x46c   :  { %1903 = vrot.lane.b32.xlu1 %v1881_v40, %s3256_s1 }
 0x46d   :  { %2383 = vrot.lane.b32.xlu0 %v2365_v0, %s3259_s15 }
 0x470   :  { %1905 = vrot.lane.b32.xlu1 %v1889_v23, %s3256_s1 }
 0x471   :  { %1907 = vrot.lane.b32.xlu0 %v1897_v47, %s3256_s1 }
 0x474   :  { %2379 = vrot.lane.b32.xlu1 %v2363_v51, %s3259_s15 }
 0x475   :  { %2438 = vrot.lane.b32.xlu0 %v2431_v49, %s3260_s16 }
 0x478   :  { %2381 = vrot.lane.b32.xlu1 %v2364_v36, %s3259_s15 }
 0x479   :  { %2412 = vrot.lane.b32.xlu0 %v2396_v38, %s3256_s1 }
 0x47c   :  { %2436 = vrot.lane.b32.xlu1 %v2429_v55, %s3260_s16 }
 0x47d   :  { %2387 = vrot.lane.b32.xlu0 %v2367_v59, %s3259_s15 }
 0x480   :  { %2385 = vrot.lane.b32.xlu1 %v2366_v21, %s3259_s15 }
 0x481   :  { %2416 = vrot.lane.b32.xlu0 %v2409_v14, %s3256_s1 }
 0x484   :  { %2414 = vrot.lane.b32.xlu1 %v2401_v54, %s3256_s1 }
 0x485   :  { %2442 = vrot.lane.b32.xlu0 %v2432_v41, %s3260_s16 }
 0x488   :  { %2440 = vrot.lane.b32.xlu1 %v2433_v9, %s3260_s16 }
 0x48c   :  { %2418 = vrot.lane.b32.xlu1 %v2410_v20, %s3256_s1 }
 0x4a8   :  { %v2033_v15 = vpop.permute.xlu1 %2032 }
 0x4a9   :  { %v2068_v60 = vsel %vm467_vm7, %v1992_v6, %v2033_v15 }
 0x4ab   :  { %v2035_v48 = vpop.permute.xlu0 %2034 }
 0x4ae   :  { %v2041_v26 = vpop.permute.xlu1 %2040 }
 0x4af   :  { %v2037_v11 = vpop.permute.xlu0 %2036 }
 0x4b2   :  { %v2039_v35 = vpop.permute.xlu1 %2038 }
 0x4b3   :  { %v1998_v3 = vpop.permute.xlu0 %1997 }
 0x4b4   :  { %v2077_v1 = vsel %vm467_vm7, %v1998_v3, %v2039_v35 }
 0x4b6   :  { %v1994_v40 = vpop.permute.xlu1 %1993 }
 0x4b7   :  { %v2000_v24 = vpop.permute.xlu0 %1999  ;;  %v2071_v57 = vsel %vm467_vm7, %v1994_v40, %v2035_v48 }
 0x4b8   :  { %v2080_v58 = vsel %vm467_vm7, %v2000_v24, %v2041_v26  ;;  %v3236_v26 = vld [vmem:[%s4616_s3 + $0x8] sm:$0xff]  }
 0x4ba   :  { %v1996_v17 = vpop.permute.xlu1 %1995 }
 0x4bb   :  { %v4353_v0 = vpop.permute.xlu0 %1856  ;;  %v2074_v47 = vsel %vm467_vm7, %v1996_v17, %v2037_v11 }
 0x4be   :  { %v4355_v61 = vpop.permute.xlu1 %1854 }
 0x4bf   :  { %v4357_v10 = vpop.permute.xlu0 %1933 }
 0x4c2   :  { %v4359_v39 = vpop.permute.xlu1 %1858 }
 0x4c3   :  { %v2061_v32 = vpop.permute.xlu0 %2060 }
 0x4c4   :  { %v2086_v63 = vsel %vm483_vm8, %v2074_v47, %v2061_v32 }
 0x4c5   :  { %v2107_v49 = vshrl.u32 %v2086_v63, 16  ;;  %v2110_v46 = vshll.u32 %v2086_v63, 16 }
 0x4c6   :  { %v4361_v13 = vpop.permute.xlu1 %1860 }
 0x4c7   :  { %v2063_v23 = vpop.permute.xlu0 %2062  ;;  %v2109_v59 = vrot.slane %v2107_v49, 7 }
 0x4c8   :  { %v2088_v18 = vsel %vm483_vm8, %v2077_v1, %v2063_v23  ;;  %v3237_v23 = vld [vmem:[%s4616_s3 + $0x10] ss:$0 sps:$4 sm:$0xff]  }
 0x4c9   :  { %v2114_v51 = vshrl.u32 %v2088_v18, 16  ;;  %v2117_v30 = vshll.u32 %v2088_v18, 16  ;;  %v2112_v6 = vor.u32 %v2110_v46, %v2109_v59 }
 0x4ca   :  { %v2057_v56 = vpop.permute.xlu1 %2056 }
 0x4cb   :  { %v1902_v37 = vpop.permute.xlu0 %1901  ;;  %v2082_v50 = vsel %vm483_vm8, %v2068_v60, %v2057_v56  ;;  %v2116_v4 = vrot.slane %v2114_v51, 7  ;;  %v2295_v56 = vsel %vm875_vm6, %v3237_v23, 0 }
 0x4cc   :  { %v2097_v8 = vshrl.u32 %v2082_v50, 16  ;;  %v1937_v3 = vsel %vm467_vm7, %v1853_v53, %v1902_v37 }
 0x4cd   :  { %v2119_v14 = vor.u32 %v2117_v30, %v2116_v4 }
 0x4ce   :  { %v2059_v36 = vpop.permute.xlu1 %2058  ;;  %v2099_v54 = vrot.slane %v2097_v8, 7 }
 0x4cf   :  { %v2084_v38 = vsel %vm483_vm8, %v2071_v57, %v2059_v36  ;;  %v1926_v2 = vpop.permute.xlu0 %1925  ;;  %v2120_v24 = vsel %vm683_vm3, %v2109_v59, %v2119_v14 }
 0x4d0   :  { %v2100_v55 = vshrl.u32 %v2084_v38, 16  ;;  %v2103_v33 = vshll.u32 %v2084_v38, 16  ;;  %v1951_v17 = vsel %vm483_vm8, %v1937_v3, %v1926_v2 }
 0x4d1   :  { %v1965_v53 = vmul.bf16 %v1951_v17, %v3960_v43 }
 0x4d2   :  { %v2102_v19 = vrot.slane %v2100_v55, 7  ;;  %v2065_v21 = vpop.permute.xlu1 %2064 }
 0x4d3   :  { %v2090_v52 = vsel %vm483_vm8, %v2080_v58, %v2065_v21  ;;  %v1930_v20 = vpop.permute.xlu0 %1929  ;;  %v2224_v37 = vshrl.u32 %v1965_v53, 16  ;;  %v2227_v49 = vshll.u32 %v1965_v53, 16 }
 0x4d4   :  { %v2105_v41 = vor.u32 %v2103_v33, %v2102_v19  ;;  %v2121_v9 = vshrl.u32 %v2090_v52, 16  ;;  %v2113_v35 = vsel %vm683_vm3, %v2102_v19, %v2112_v6  ;;  %v2124_v32 = vshll.u32 %v2090_v52, 16 }
 0x4d5   :  { %v2229_v2 = vrot.slane %v2227_v49, 7 }
 0x4d6   :  { %v1928_v15 = vpop.permute.xlu1 %1927  ;;  %v2106_v48 = vsel %vm683_vm3, %v2099_v54, %v2105_v41  ;;  %v2123_v11 = vrot.slane %v2121_v9, 7 }
 0x4d7   :  { %3100 = vmatprep.mubr.msk.bf16.mxu1 %vm862_vm9, %v2106_v48  ;;  %v1910_v40 = vpop.permute.xlu0 %1909 }
 0x4d8   :  { %3101 = vmatmul.mubr.msk.bf16.vlgmr.msra.gmra.mrb[4].mxu1 %vm862_vm9, %v2113_v35  ;;  %v2126_v47 = vor.u32 %v2124_v32, %v2123_v11  ;;  %v1949_v43 = vsel %vm467_vm7, %v4361_v13, %v1910_v40  ;;  %v2226_v13 = vrot.slane %v2224_v37, 6 }
 0x4d9   :  { %3104 = vmatprep.mubr.msk.bf16.mxu1 %vm862_vm9, %v2120_v24  ;;  %3109 = vmatpush3.bf16.msra.mxu1 %v4298_v28  ;;  %v3238_v28 = vld [vmem:[%s4616_s3 + $0x28] sm:$0xff]  }
 0x4da   :  { %v1932_v1 = vpop.permute.xlu1 %1931  ;;  %3110 = vmatprep.subr.bf16.mxu1 %v3236_v26  ;;  %v2127_v51 = vsel %vm683_vm3, %v2116_v4, %v2126_v47  ;;  %v2230_v41 = vor.u32 %v2229_v2, %v2226_v13  ;;  %vm4681_vm3 = vsmask.f32 1280 }
 0x4db   :  { %v2435_v18 = vpop.permute.xlu0 %2434  ;;  %vm4682_vm4 = vmmov %vm4681_vm3 }
 0x4dc   :  { %vm4683_vm5 = vmmov %vm4681_vm3 }
 0x4dd   :  { %3111 = vmatpush3.bf16.msra.mxu1 %v3236_v26  ;;  %vm4684_vm10 = vmmov %vm4681_vm3 }
 0x4de   :  { %v1904_v63 = vpop.permute.xlu1 %1903  ;;  %3200 = vmatprep.subr.msk.bf16.mxu1 %vm875_vm6, %v3237_v23 }
 0x4df   :  { %v1940_v60 = vsel %vm467_vm7, %v4355_v61, %v1904_v63  ;;  %v4401_v57 = vpop.permute.xlu0 %2383  ;;  %v1963_v61 = vsel %vm483_vm8, %v1949_v43, %v4357_v10 }
 0x4e0   :  { %v1954_v50 = vsel %vm483_vm8, %v1940_v60, %v1928_v15  ;;  %3105 = vmatmul.mubr.msk.bf16.gmra.mrb[8].mxu1 %vm862_vm9, %v2127_v51  ;;  %v1969_v21 = vmul.bf16 %v1963_v61, %v4015_v27 }
 0x4e1   :  { %v1966_v36 = vmul.bf16 %v1954_v50, %v3976_v34  ;;  %3113 = vmatpush3.bf16.msra.mxu1 %v2295_v56 }
 0x4e2   :  { %v1906_v38 = vpop.permute.xlu1 %1905  ;;  %3122 = vmatprep.subr.bf16.mxu1 %v3238_v28  ;;  %v2262_v11 = vshll.u32 %v1969_v21, 16 }
 0x4e3   :  { %v2232_v4 = vshrl.u32 %v1966_v36, 16  ;;  %v2235_v8 = vshll.u32 %v1966_v36, 16  ;;  %v1943_v55 = vsel %vm467_vm7, %v4353_v0, %v1906_v38  ;;  %v1908_v58 = vpop.permute.xlu0 %1907 }
 0x4e4   :  { %v1957_v59 = vsel %vm483_vm8, %v1943_v55, %v1930_v20  ;;  %v1946_v33 = vsel %vm467_vm7, %v4359_v39, %v1908_v58  ;;  %v2264_v63 = vrot.slane %v2262_v11, 7 }
 0x4e5   :  { %v2234_v30 = vrot.slane %v2232_v4, 6  ;;  %v2237_v19 = vrot.slane %v2235_v8, 7  ;;  %v1967_v34 = vmul.bf16 %v1957_v59, %v3990_v12  ;;  %v1960_v10 = vsel %vm483_vm8, %v1946_v33, %v1932_v1 }
 0x4e6   :  { %v2380_v46 = vpop.permute.xlu1 %2379  ;;  %v1968_v0 = vmul.bf16 %v1960_v10, %v4035_v44  ;;  %v2259_v12 = vshrl.u32 %v1969_v21, 16  ;;  %v3239_v44 = vld [vmem:[%s4616_s3 + $0x30] sm:$0xff]  }
 0x4e7   :  { %v2241_v52 = vshrl.u32 %v1967_v34, 16  ;;  %v2244_v14 = vshll.u32 %v1967_v34, 16  ;;  %v2238_v54 = vor.u32 %v2237_v19, %v2234_v30  ;;  %v2439_v9 = vpop.permute.xlu0 %2438 }
 0x4e8   :  { %v2250_v15 = vshrl.u32 %v1968_v0, 16  ;;  %v2253_v48 = vshll.u32 %v1968_v0, 16  ;;  %v2261_v1 = vrot.slane %v2259_v12, 6 }
 0x4e9   :  { %v2243_v20 = vrot.slane %v2241_v52, 6  ;;  %v2246_v6 = vrot.slane %v2244_v14, 7  ;;  %v2239_v26 = vsel %vm4681_vm3, %v2230_v41, %v2238_v54 }
 0x4ea   :  { %v2382_v39 = vpop.permute.xlu1 %2381  ;;  %v2252_v35 = vrot.slane %v2250_v15, 6  ;;  %v2255_v3 = vrot.slane %v2253_v48, 7  ;;  %3114 = vmatprep.mubr.msk.bf16.mxu1 %vm862_vm9, %v2239_v26  ;;  %v2265_v61 = vor.u32 %v2264_v63, %v2261_v1 }
 0x4eb   :  { %v2247_v27 = vor.u32 %v2246_v6, %v2243_v20  ;;  %v2413_v40 = vpop.permute.xlu0 %2412  ;;  %v2448_v23 = vsel %vm467_vm7, %v2382_v39, %v1906_v38 }
 0x4ec   :  { %v2446_v24 = vsel %vm467_vm7, %v2380_v46, %v2413_v40  ;;  %v2256_v32 = vor.u32 %v2255_v3, %v2252_v35  ;;  %v2676_v35 = vld [vmem:[%s4612_s5] sm:$0xff]  ;;  %v2678_v3 = vld [vmem:[%s4612_s5 + $0x10] sm:$0xff] }
 0x4ed   :  { %v2248_v17 = vsel %vm4682_vm4, %v2238_v54, %v2247_v27  ;;  %v2459_v47 = vsel %vm483_vm8, %v2446_v24, %v2435_v18  ;;  %v3240_v18 = vld [vmem:[%s4616_s3 + $0x38] ss:$0 sps:$4 sm:$0xff]  }
 0x4ee   :  { %3115 = vmatmul.mubr.msk.bf16.vlgmr.msra.gmra.mrb[4].mxu1 %vm862_vm9, %v2248_v17  ;;  %v2437_v53 = vpop.permute.xlu1 %2436  ;;  %v2473_v56 = vmul.bf16 %v2459_v47, %v4044_v42  ;;  %v2257_v51 = vsel %vm4683_vm5, %v2247_v27, %v2256_v32  ;;  %v2266_v4 = vsel %vm4684_vm10, %v2256_v32, %v2265_v61 }
 0x4ef   :  { %v2462_v60 = vsel %vm483_vm8, %v2448_v23, %v2437_v53  ;;  %3123 = vmatpush3.bf16.msra.mxu1 %v3238_v28  ;;  %3118 = vmatprep.mubr.msk.bf16.mxu1 %vm862_vm9, %v2257_v51  ;;  %v2388_v43 = vpop.permute.xlu0 %2387  ;;  %v2548_v28 = vsel %vm875_vm6, %v3240_v18, 0 }
 0x4f0   :  { %v2474_v37 = vmul.bf16 %v2462_v60, %v3883_v62  ;;  %3124 = vmatprep.subr.bf16.mxu1 %v3239_v44  ;;  %v2487_v49 = vshll.u32 %v2473_v56, 16  ;;  %v2485_v38 = vshrl.u32 %v2473_v56, 16 }
 0x4f2   :  { %v2492_v50 = vshll.u32 %v2474_v37, 16  ;;  %v2386_v36 = vpop.permute.xlu1 %2385  ;;  %v2489_v42 = vrot.slane %v2487_v49, 1  ;;  %v2496_v33 = vshrl.u32 %v2474_v37, 16 }
 0x4f3   :  { %3125 = vmatpush3.bf16.msra.mxu1 %v3239_v44  ;;  %v2417_v13 = vpop.permute.xlu0 %2416  ;;  %v2679_v44 = vld [vmem:[%s4612_s5 + $0x18] sm:$0xff] }
 0x4f4   :  { %3201 = vmatprep.subr.msk.bf16.mxu1 %vm875_vm6, %v3240_v18  ;;  %v2494_v62 = vrot.slane %v2492_v50, 1  ;;  %v2490_v8 = vor.u32 %v2489_v42, %v2485_v38  ;;  %v2454_v19 = vsel %vm467_vm7, %v2386_v36, %v2417_v13  ;;  %v3162_v24 = vpack.c.bf16 %v2679_v44, %v2678_v3 }
 0x4f6   :  { %3119 = vmatmul.mubr.msk.bf16.gmra.mrb[8].mxu1 %vm862_vm9, %v2266_v4  ;;  %v2415_v55 = vpop.permute.xlu1 %2414  ;;  %v2495_v59 = vsel %vm336_vm1, %v2490_v8, %v2494_v62  ;;  %v2498_v52 = vor.u32 %v2496_v33, %v2494_v62 }
 0x4f7   :  { %v2451_v2 = vsel %vm467_vm7, %v4401_v57, %v2415_v55  ;;  %3127 = vmatpush3.bf16.msra.mxu1 %v2548_v28  ;;  %3128 = vmatprep.mubr.msk.bf16.mxu1 %vm862_vm9, %v2495_v59  ;;  %v2443_v41 = vpop.permute.xlu0 %2442 }
 0x4f8   :  { %v2465_v58 = vsel %vm483_vm8, %v2451_v2, %v2439_v9 }
 0x4f9   :  { %v2475_v30 = vmul.bf16 %v2465_v58, %v3896_v29 }
 0x4fa   :  { %v2441_v34 = vpop.permute.xlu1 %2440 }
 0x4fb   :  { %v2500_v21 = vshll.u32 %v2475_v30, 16  ;;  %v2468_v10 = vsel %vm483_vm8, %v2454_v19, %v2441_v34  ;;  %v2504_v14 = vshrl.u32 %v2475_v30, 16 }
 0x4fc   :  { %v2476_v46 = vmul.bf16 %v2468_v10, %v3913_v7 }
 0x4fd   :  { %v2502_v57 = vrot.slane %v2500_v21, 1 }
 0x4fe   :  { %v2508_v0 = vshll.u32 %v2476_v46, 16  ;;  %v2419_v54 = vpop.permute.xlu1 %2418  ;;  %v2512_v12 = vshrl.u32 %v2476_v46, 16 }
 0x4ff   :  { %v2457_v9 = vsel %vm467_vm7, %v2388_v43, %v2419_v54  ;;  %v2503_v20 = vsel %vm336_vm1, %v2498_v52, %v2502_v57  ;;  %v2506_v29 = vor.u32 %v2504_v14, %v2502_v57 }
 0x500   :  { %v2510_v6 = vrot.slane %v2508_v0, 1  ;;  %v2471_v15 = vsel %vm483_vm8, %v2457_v9, %v2443_v41  ;;  %3129 = vmatmul.mubr.msk.bf16.vlgmr.msra.gmra.mrb[4].mxu1 %vm862_vm9, %v2503_v20  ;;  %vm4686_vm8 = vmmov 0  }
 0x501   :  { %v2477_v48 = vmul.bf16 %v2471_v15, %v3907_v5  ;;  %v2677_v5 = vld [vmem:[%s4612_s5 + $0x8] sm:$0xff] }
 0x502   :  { %v2511_v7 = vsel %vm336_vm1, %v2506_v29, %v2510_v6  ;;  %v2514_v39 = vor.u32 %v2512_v12, %v2510_v6  ;;  %v3159_v40 = vpack.c.bf16 %v2677_v5, %v2676_v35 }
 0x503   :  { %v2516_v26 = vshll.u32 %v2477_v48, 16  ;;  %3132 = vmatprep.mubr.msk.bf16.mxu1 %vm862_vm9, %v2511_v7 }
 0x504   :  { %3160 = vmatpush3.bf16.msra.mxu0 %v3159_v40 }
 0x505   :  { %v2518_v11 = vrot.slane %v2516_v26, 1  ;;  %3161 = vmatprep.subr.bf16.mxu0 %v3261_v45 }
 0x507   :  { %v2519_v27 = vsel %vm336_vm1, %v2514_v39, %v2518_v11  ;;  %vm4685_vm1 = vcmask 1040384  }
 0x508   :  { %3133 = vmatmul.mubr.msk.bf16.gmra.mrb[8].mxu1 %vm862_vm9, %v2519_v27  ;;  %3163 = vmatpush3.bf16.msra.mxu0 %v3162_v24  ;;  %v2775_v24 = vld [vmem:[%s4613_s6] sm:$0xf] }
 0x509   :  { %3147 = vmatprep.subr.mxu0 %v3263_v25 }
 0x5d3   :  { %v4469_v17 = vpop.f32.mrb[4].mxu1 }
 0x5d4   :  { %v4471_v32 = vpop.f32.mrb[5].mxu1  ;;  %v2648_v53 = vmul.f32 %v4469_v17, %v4469_v17  ;;  %v2628_v51 = vsel %vm47_vm0, %v4469_v17, 0.0 }
 0x5d5   :  { %v2646_v1 = vmul.f32 %v4471_v32, %v4471_v32  ;;  %v4475_v23 = vpop.f32.mrb[6].mxu1  ;;  %v2625_v45 = vsel %vm47_vm0, %v4471_v32, 0.0 }
 0x5d6   :  { %v4477_v47 = vpop.f32.mrb[7].mxu1  ;;  %v2649_v18 = vmul.f32 %v4475_v23, %v4475_v23  ;;  %v2657_v36 = vsel %vm47_vm0, %v2648_v53, 0.0  ;;  %v2630_v38 = vsel %vm47_vm0, %v4475_v23, 0.0 }
 0x5d7   :  { %v2626_v63 = vsel %vm47_vm0, %v4477_v47, 0.0  ;;  %v2647_v56 = vmul.f32 %v4477_v47, %v4477_v47  ;;  %v2654_v37 = vsel %vm47_vm0, %v2646_v1, 0.0 }
 0x5d8   :  { %v2627_v60 = vadd.f32 %v2626_v63, %v2625_v45  ;;  %v2659_v4 = vsel %vm47_vm0, %v2649_v18, 0.0  ;;  %v2623_v18 = vld [vmem:[%s4614_s4 + $0x2] sm:$0x1] }
 0x5d9   :  { %v2655_v49 = vsel %vm47_vm0, %v2647_v56, 0.0 }
 0x5da   :  { %v2629_v43 = vadd.f32 %v2628_v51, %v2627_v60  ;;  %v2656_v50 = vadd.f32 %v2655_v49, %v2654_v37 }
 0x5db   :  { %v4496_v42 = vpop.f32.mrb[8].mxu1 }
 0x5dc   :  { %v2658_v61 = vadd.f32 %v2657_v36, %v2656_v50  ;;  %v4498_v28 = vpop.f32.mrb[9].mxu1  ;;  %v2631_v62 = vadd.f32 %v2630_v38, %v2629_v43  ;;  %v2652_v30 = vmul.f32 %v4496_v42, %v4496_v42  ;;  %v2636_v46 = vsel %vm47_vm0, %v4496_v42, 0.0  ;;  %v2624_v36 = vld [vmem:[%s4614_s4 + $0x3] sm:$0x1] }
 0x5dd   :  { %v2632_v8 = vsel %vm47_vm0, %v4498_v28, 0.0  ;;  %v2650_v55 = vmul.f32 %v4498_v28, %v4498_v28  ;;  %v4505_v13 = vpop.f32.mrb[10].mxu1 }
 0x5de   :  { %v2633_v2 = vadd.f32 %v2632_v8, %v2631_v62  ;;  %v2660_v59 = vadd.f32 %v2659_v4, %v2658_v61  ;;  %v4507_v58 = vpop.f32.mrb[11].mxu1  ;;  %v2653_v52 = vmul.f32 %v4505_v13, %v4505_v13  ;;  %v2665_v54 = vsel %vm47_vm0, %v2652_v30, 0.0 }
 0x5df   :  { %v2661_v19 = vsel %vm47_vm0, %v2650_v55, 0.0  ;;  %v2634_v34 = vsel %vm47_vm0, %v4507_v58, 0.0  ;;  %v2651_v33 = vmul.f32 %v4507_v58, %v4507_v58  ;;  %v2638_v41 = vsel %vm47_vm0, %v4505_v13, 0.0 }
 0x5e0   :  { %v2662_v21 = vadd.f32 %v2661_v19, %v2660_v59  ;;  %v2635_v10 = vadd.f32 %v2634_v34, %v2633_v2  ;;  %v2667_v29 = vsel %vm47_vm0, %v2653_v52, 0.0 }
 0x5e1   :  { %v2663_v57 = vsel %vm47_vm0, %v2651_v33, 0.0 }
 0x5e2   :  { %v2637_v14 = vadd.f32 %v2636_v46, %v2635_v10  ;;  %v2664_v0 = vadd.f32 %v2663_v57, %v2662_v21 }
 0x5e4   :  { %v2639_v9 = vadd.f32 %v2638_v41, %v2637_v14  ;;  %v2666_v20 = vadd.f32 %v2665_v54, %v2664_v0  ;;  %v3248_v54 = vld [vmem:[%s4610_s0 + $0x18] sm:$0xff] }
 0x5e6   :  { %v2640_v6 = vrot.slane %v2639_v9, 4  ;;  %v2668_v15 = vadd.f32 %v2667_v29, %v2666_v20  ;;  %v3250_v29 = vld [vmem:[%s4610_s0 + $0x28] sm:$0xff] }
 0x5e8   :  { %v2641_v48 = vadd.f32 %v2640_v6, %v2639_v9  ;;  %v2669_v7 = vrot.slane %v2668_v15, 4  ;;  %v3249_v9 = vld [vmem:[%s4610_s0 + $0x20] sm:$0xff] }
 0x5ea   :  { %v2642_v12 = vrot.slane %v2641_v48, 2  ;;  %v2670_v26 = vadd.f32 %v2669_v7, %v2668_v15  ;;  %v3251_v15 = vld [vmem:[%s4610_s0 + $0x30] sm:$0xff]  ;;  %v3252_v7 = vld [vmem:[%s4610_s0 + $0x38] sm:$0xff] }
 0x5ec   :  { %v2643_v39 = vadd.f32 %v2642_v12, %v2641_v48  ;;  %v2671_v11 = vrot.slane %v2670_v26, 2 }
 0x5ee   :  { %v2644_v27 = vrot.slane %v2643_v39, 1  ;;  %v2672_v35 = vadd.f32 %v2671_v11, %v2670_v26 }
 0x5f0   :  { %v2673_v5 = vrot.slane %v2672_v35, 1  ;;  %v2645_v3 = vadd.f32 %v2644_v27, %v2643_v39 }
 0x5f2   :  { %v2674_v40 = vadd.f32 %v2673_v5, %v2672_v35 }
 0x5f4   :  { %v2675_v44 = vsel %vm4685_vm1, %v2645_v3, %v2674_v40 }
 0x5f5   :  { %3145 = vmatmul.mubr.msk.f32.vlgmr.msra.gmra.mrb[8].mxu0 %vm47_vm0, %v2675_v44 }
 0x5f6   :  { %3149 = vmatprep.mubr.msk.f32.mxu0 %vm4686_vm8, %v3263_v25  ;;  %3148 = vmatpush3.msk.msra.mxu0 %vm875_vm6, %v2775_v24  ;;  %v2763_v25 = vrot.slane %v2623_v18, 7  ;;  %vm4687_vm6 = vmmov %vm4685_vm1 }
 0x6c8   :  { %v2749_v1 = vpop.f32.mrb[8].mxu0 }
 0x6c9   :  { %v2753_v53 = vmul.f32 0.001953125, %v2749_v1  ;;  %v3146_v45 = vpop.f32.mrb[9].mxu0 }
 0x6cb   :  { %v2754_v63 = vmul.f32 %v2753_v53, %v2753_v53 }
 0x6cd   :  { %v2756_v56 = vrot.slane %v2754_v63, 7 }
 0x6cf   :  { %v2758_v60 = vsub.f32 %v2753_v53, %v2756_v56 }
 0x6d1   :  { %v2759_v51 = vmax.f32 %v2758_v60, 0.0 }
 0x6d3   :  { %v2760_v37 = vadd.f32 1e-05, %v2759_v51 }
 0x6d5   :  { %3243 = vrsqrt.f32 %v2760_v37 }
 0x6df   :  { %v3244_v49 = vpop.eup %3243 }
 0x6e0   :  { %v2765_v43 = vmul.f32 %v3244_v49, %v2763_v25 }
 0x6e2   :  { %v2767_v50 = vrot.slane %v2765_v43, 1 }
 0x6e4   :  { %v2769_v38 = vmul.f32 %v2767_v50, %v2753_v53 }
 0x6e6   :  { %v2770_v61 = vsub.f32 %v2624_v36, %v2769_v38 }
 0x6e8   :  { %v2772_v62 = vrot.slane %v2770_v61, 7 }
 0x6ea   :  { %v2774_v4 = vsel %vm4687_vm6, %v2767_v50, %v2772_v62 }
 0x6eb   :  { %3150 = vmatmul.mubr.msk.f32.vlgmr.msra.gmra.mrb[10].mxu0 %vm467_vm7, %v2774_v4 }
 0x7be   :  { %v2848_v8 = vpop.f32.mrb[10].mxu0 }
 0x7bf   :  { %v2855_v55 = vrot.slane %v2848_v8, %v1775_v31  ;;  %v3151_v2 = vpop.f32.mrb[11].mxu0  ;;  %v2867_v59 = vrot.slane %v2848_v8, %v1787_v22 }
 0x7c1   :  { %v2856_v30 = vmul.f32 %v2855_v55, %v4471_v32  ;;  %v2857_v19 = vmul.f32 %v2855_v55, %v4477_v47  ;;  %v2858_v34 = vmul.f32 %v4469_v17, %v2855_v55  ;;  %v2859_v33 = vmul.f32 %v4475_v23, %v2855_v55  ;;  %v3245_v17 = vld [vmem:[%s4610_s0] sm:$0xff] }
 0x7c2   :  { %v2860_v21 = vmul.f32 %v2855_v55, %v4498_v28  ;;  %v2861_v10 = vmul.f32 %v2855_v55, %v4507_v58  ;;  %v2862_v46 = vmul.f32 %v4496_v42, %v2855_v55  ;;  %v2863_v31 = vmul.f32 %v4505_v13, %v2855_v55  ;;  %v3246_v28 = vld [vmem:[%s4610_s0 + $0x8] sm:$0xff]  ;;  %v3247_v13 = vld [vmem:[%s4610_s0 + $0x10] sm:$0xff] }
 0x7c3   :  { %v2868_v52 = vadd.f32 %v2867_v59, %v2856_v30  ;;  %v2869_v57 = vadd.f32 %v2867_v59, %v2857_v19  ;;  %v2870_v16 = vadd.f32 %v2867_v59, %v2858_v34  ;;  %v2871_v22 = vadd.f32 %v2867_v59, %v2859_v33 }
 0x7c4   :  { %v2872_v14 = vadd.f32 %v2867_v59, %v2860_v21  ;;  %v2873_v32 = vadd.f32 %v2867_v59, %v2861_v10  ;;  %v2874_v0 = vadd.f32 %v2867_v59, %v2862_v46  ;;  %v2875_v47 = vadd.f32 %v2867_v59, %v2863_v31 }
 0x7c5   :  { %v2876_v23 = vadd.f32 %v3245_v17, %v2868_v52  ;;  %v2877_v42 = vadd.f32 %v3246_v28, %v2869_v57  ;;  %v2878_v58 = vadd.f32 %v3247_v13, %v2870_v16  ;;  %v2879_v41 = vadd.f32 %v3248_v54, %v2871_v22 }
 0x7c6   :  { %v2880_v20 = vadd.f32 %v3249_v9, %v2872_v14  ;;  %v2881_v6 = vadd.f32 %v3250_v29, %v2873_v32  ;;  %v2882_v48 = vadd.f32 %v3251_v15, %v2874_v0  ;;  %v2883_v12 = vadd.f32 %v3252_v7, %v2875_v47 }
 0x7c7   :  { %2884 = vst.msk [vmem:[%s4617_s8] sm:$0xff] %vm47_vm0, %v2876_v23  ;;  %2885 = vst.msk [vmem:[%s4617_s8 + $0x8] sm:$0xff] %vm47_vm0, %v2877_v42 }
 0x7c8   :  { %2886 = vst.msk [vmem:[%s4617_s8 + $0x10] sm:$0xff] %vm47_vm0, %v2878_v58  ;;  %2887 = vst.msk [vmem:[%s4617_s8 + $0x18] sm:$0xff] %vm47_vm0, %v2879_v41 }
 0x7c9   :  { %2888 = vst.msk [vmem:[%s4617_s8 + $0x20] sm:$0xff] %vm47_vm0, %v2880_v20  ;;  %2889 = vst.msk [vmem:[%s4617_s8 + $0x28] sm:$0xff] %vm47_vm0, %v2881_v6 }
 0x7ca   :  { %2890 = vst.msk [vmem:[%s4617_s8 + $0x30] sm:$0xff] %vm47_vm0, %v2882_v48  ;;  %2891 = vst.msk [vmem:[%s4617_s8 + $0x38] sm:$0xff] %vm47_vm0, %v2883_v12 }

</bundles_post_ra>
